<compile_context>
chip_gen: v7x
topology: tpu7x:2x2x1
jax: 0.10.0
libtpu: 0.0.40
codegen_flags: <defaults>
</compile_context>

<pallas_src>
import functools

import jax
import jax.numpy as jnp
from jax.experimental import pallas as pl
from jax.experimental.pallas import tpu as pltpu

IN_FEAT = 2 * 14 * 14      # 392
HID = 390                  # logical hidden / output width
HID_PAD = 512              # lane-padded width (multiple of 128)


def _mlp_kernel(x_ref, w1_ref, b1_ref, w2_ref, b2_ref, o_ref):
    # x_ref:  (TB, 392)    batch tile of flattened inputs
    # w1_ref: (392, 512)   layer-1 weight, pre-transposed, N padded to 512
    # b1_ref: (1, 512)     layer-1 bias, padded with zeros
    # w2_ref: (512, 512)   layer-2 weight, pre-transposed, K/N padded to 512
    # b2_ref: (1, 512)     layer-2 bias, padded with zeros
    # o_ref:  (TB, 512)    lane-dense output tile (cols 390:512 are zeros)
    x = x_ref[...]
    h = jnp.dot(x, w1_ref[...], preferred_element_type=jnp.float32) + b1_ref[...]
    h = jnp.maximum(h, 0.0)          # padded cols: relu(0 + 0) = 0
    y = jnp.dot(h, w2_ref[...], preferred_element_type=jnp.float32) + b2_ref[...]
    y = jnp.maximum(y, 0.0)          # padded cols stay 0
    o_ref[...] = y.astype(o_ref.dtype)


def prepare_params(w1, b1, w2, b2):
    """One-time weight prep: transpose + lane padding.

    Call once at init (weights are static for inference); do NOT call per
    forward — that was per-call HBM transpose traffic in the old version.
    """
    w1 = w1.astype(jnp.float32)
    w2 = w2.astype(jnp.float32)
    w1_p = jnp.zeros((IN_FEAT, HID_PAD), jnp.float32).at[:, :HID].set(w1.T)
    b1_p = jnp.zeros((1, HID_PAD), jnp.float32).at[:, :HID].set(b1.astype(jnp.float32))
    w2_p = jnp.zeros((HID_PAD, HID_PAD), jnp.float32).at[:HID, :HID].set(w2.T)
    b2_p = jnp.zeros((1, HID_PAD), jnp.float32).at[:, :HID].set(b2.astype(jnp.float32))
    return w1_p, b1_p, w2_p, b2_p


def _round_up(n, m):
    return ((n + m - 1) // m) * m


@functools.partial(jax.jit, static_argnames=("block_b",))
def mlp_cmnist_forward(x_nchw, w1_p, b1_p, w2_p, b2_p, block_b=256):
    """x_nchw: (B, 2, 14, 14) f32; w*_p/b*_p from prepare_params()."""
    B = x_nchw.shape[0]
    n_feat = x_nchw.shape[1] * x_nchw.shape[2] * x_nchw.shape[3]
    assert n_feat == IN_FEAT, "MLP_cmnist expects 2x14x14 inputs"

    # Same flattening as torch .view (row-major on NCHW).
    x_flat = x_nchw.reshape(B, IN_FEAT).astype(jnp.float32)

    # Batch tile: at least 8 (sublane multiple), at most block_b.
    tb = min(block_b, _round_up(B, 8))
    b_pad = _round_up(B, tb)
    if b_pad != B:
        x_flat = jnp.pad(x_flat, ((0, b_pad - B), (0, 0)))

    grid = (b_pad // tb,)

    out_padded = pl.pallas_call(
        _mlp_kernel,
        out_shape=jax.ShapeDtypeStruct((b_pad, HID_PAD), jnp.float32),
        grid_spec=pltpu.PrefetchScalarGridSpec(
            num_scalar_prefetch=0,
            grid=grid,
            in_specs=[
                # x tile marches over the batch axis.
                pl.BlockSpec((tb, IN_FEAT), lambda i: (i, 0)),
                # Weights / biases stay resident in VMEM across all tiles.
                pl.BlockSpec((IN_FEAT, HID_PAD), lambda i: (0, 0)),
                pl.BlockSpec((1, HID_PAD), lambda i: (0, 0)),
                pl.BlockSpec((HID_PAD, HID_PAD), lambda i: (0, 0)),
                pl.BlockSpec((1, HID_PAD), lambda i: (0, 0)),
            ],
            out_specs=pl.BlockSpec((tb, HID_PAD), lambda i: (i, 0)),
        ),
        compiler_params=pltpu.CompilerParams(
            # Batch axis is independent per tile: shard across TCs on v7x,
            # harmless on v5e/v6e.
            dimension_semantics=("parallel",),
        ),
    )(x_flat, w1_p, b1_p, w2_p, b2_p)

    # Drop batch padding and the lane-padded columns.
    return out_padded[:B, :HID]


def xavier_uniform(key, shape):
    # Matches torch.nn.init.xavier_uniform_ for a Linear weight (fan_out, fan_in).
    fan_out, fan_in = shape
    bound = (6.0 / (fan_in + fan_out)) ** 0.5
    return jax.random.uniform(key, shape, dtype=jnp.float32,
                              minval=-bound, maxval=bound)


if __name__ == "__main__":
    key = jax.random.PRNGKey(0)
    kx, kw1, kw2 = jax.random.split(key, 3)

    # Small deterministic example: batch=2, NCHW = (2, 2, 14, 14)
    x = jax.random.normal(kx, (2, 2, 14, 14), dtype=jnp.float32)

    # Parameters matching the module's __init__ shapes:
    #   self.input  = nn.Linear(392, 390) -> W1: (390, 392), b1: (390,) zeros
    #   self.hidden = nn.Linear(390, 390) -> W2: (390, 390), b2: (390,) zeros
    w1 = xavier_uniform(kw1, (390, 392))
    b1 = jnp.zeros((390,), dtype=jnp.float32)
    w2 = xavier_uniform(kw2, (390, 390))
    b2 = jnp.zeros((390,), dtype=jnp.float32)

    # One-time weight prep (transpose + lane padding), outside the hot path.
    params = prepare_params(w1, b1, w2, b2)
    params = jax.block_until_ready(params)

    out = mlp_cmnist_forward(x, *params)
    out = jax.block_until_ready(out)

    # Reference check in plain JAX (same math, outside Pallas).
    x_flat = x.reshape(x.shape[0], -1)
    ref = jnp.maximum(x_flat @ w1.T + b1, 0.0)
    ref = jnp.maximum(ref @ w2.T + b2, 0.0)
    assert out.shape == (2, 390)
    assert jnp.allclose(out, ref, atol=1e-4, rtol=1e-4)

    # Also exercise a multi-tile, non-multiple batch to verify tiling/padding.
    xb = jax.random.normal(jax.random.PRNGKey(1), (515, 2, 14, 14), dtype=jnp.float32)
    outb = jax.block_until_ready(mlp_cmnist_forward(xb, *params))
    xb_flat = xb.reshape(xb.shape[0], -1)
    refb = jnp.maximum(jnp.maximum(xb_flat @ w1.T + b1, 0.0) @ w2.T + b2, 0.0)
    assert outb.shape == (515, 390)
    assert jnp.allclose(outb, refb, atol=1e-4, rtol=1e-4)

    print("KERNEL_OK")
</pallas_src>

<mosaic_0001>
module attributes {stable_mosaic.version = 11 : i64} {
  func.func @_mlp_kernel(%arg0: i32, %arg1: memref<8x392xf32, #tpu.memory_space<vmem>>, %arg2: memref<392x512xf32, #tpu.memory_space<vmem>>, %arg3: memref<1x512xf32, #tpu.memory_space<vmem>>, %arg4: memref<512x512xf32, #tpu.memory_space<vmem>>, %arg5: memref<1x512xf32, #tpu.memory_space<vmem>>, %arg6: memref<8x512xf32, #tpu.memory_space<vmem>>) attributes {dimension_semantics = [#tpu.dimension_semantics<parallel>], iteration_bounds = array<i64: 1>, scalar_prefetch = 0 : i64, scratch_operands = 0 : i64, tpu.core_type = #tpu.core_type<tc>, window_params = [{transform_indices = @transform_0, window_bounds = array<i64: 8, 392>}, {pipeline_mode = #tpu.pipeline_mode<synchronous>, transform_indices = @transform_1, window_bounds = array<i64: 392, 512>}, {pipeline_mode = #tpu.pipeline_mode<synchronous>, transform_indices = @transform_2, window_bounds = array<i64: 1, 512>}, {pipeline_mode = #tpu.pipeline_mode<synchronous>, transform_indices = @transform_3, window_bounds = array<i64: 512, 512>}, {pipeline_mode = #tpu.pipeline_mode<synchronous>, transform_indices = @transform_4, window_bounds = array<i64: 1, 512>}, {transform_indices = @transform_5, window_bounds = array<i64: 8, 512>}]} {
    %c0 = arith.constant 0 : index
    %c0_0 = arith.constant 0 : index
    %0 = vector.load %arg1[%c0, %c0_0] : memref<8x392xf32, #tpu.memory_space<vmem>>, vector<8x392xf32>
    %c0_1 = arith.constant 0 : index
    %c0_2 = arith.constant 0 : index
    %1 = vector.load %arg2[%c0_1, %c0_2] : memref<392x512xf32, #tpu.memory_space<vmem>>, vector<392x512xf32>
    %cst = arith.constant dense<0.000000e+00> : vector<8x512xf32>
    %2 = tpu.matmul %0, %1, %cst {dimension_numbers = #tpu.dot_dimension_numbers<[1], [0], [0], [1], [0, 0, 1, 1], [], []>} : vector<8x392xf32>, vector<392x512xf32>, vector<8x512xf32> -> vector<8x512xf32>
    %c0_3 = arith.constant 0 : index
    %c0_4 = arith.constant 0 : index
    %3 = vector.load %arg3[%c0_3, %c0_4] : memref<1x512xf32, #tpu.memory_space<vmem>>, vector<1x512xf32>
    %4 = vector.broadcast %3 : vector<1x512xf32> to vector<8x512xf32>
    %5 = arith.addf %2, %4 : vector<8x512xf32>
    %cst_5 = arith.constant 0.000000e+00 : f32
    %6 = vector.broadcast %cst_5 : f32 to vector<8x512xf32>
    %7 = arith.maximumf %5, %6 : vector<8x512xf32>
    %c0_6 = arith.constant 0 : index
    %c0_7 = arith.constant 0 : index
    %8 = vector.load %arg4[%c0_6, %c0_7] : memref<512x512xf32, #tpu.memory_space<vmem>>, vector<512x512xf32>
    %cst_8 = arith.constant dense<0.000000e+00> : vector<8x512xf32>
    %9 = tpu.matmul %7, %8, %cst_8 {dimension_numbers = #tpu.dot_dimension_numbers<[1], [0], [0], [1], [0, 0, 1, 1], [], []>} : vector<8x512xf32>, vector<512x512xf32>, vector<8x512xf32> -> vector<8x512xf32>
    %c0_9 = arith.constant 0 : index
    %c0_10 = arith.constant 0 : index
    %10 = vector.load %arg5[%c0_9, %c0_10] : memref<1x512xf32, #tpu.memory_space<vmem>>, vector<1x512xf32>
    %11 = vector.broadcast %10 : vector<1x512xf32> to vector<8x512xf32>
    %12 = arith.addf %9, %11 : vector<8x512xf32>
    %cst_11 = arith.constant 0.000000e+00 : f32
    %13 = vector.broadcast %cst_11 : f32 to vector<8x512xf32>
    %14 = arith.maximumf %12, %13 : vector<8x512xf32>
    %c0_12 = arith.constant 0 : index
    %c0_13 = arith.constant 0 : index
    %15 = vector.load %arg6[%c0_12, %c0_13] : memref<8x512xf32, #tpu.memory_space<vmem>>, vector<8x512xf32>
    tpu.vector_store %arg6[%c0_12, %c0_13], %14 {strides = array<i32>} : memref<8x512xf32, #tpu.memory_space<vmem>>, vector<8x512xf32>,
    return
  }
  func.func @transform_0(%arg0: i32) -> (i32, i32) {
    %c0_i32 = arith.constant 0 : i32
    %c0_i32_0 = arith.constant 0 : i32
    return %arg0, %c0_i32 : i32, i32
  }
  func.func @transform_1(%arg0: i32) -> (i32, i32) {
    %c0_i32 = arith.constant 0 : i32
    %c0_i32_0 = arith.constant 0 : i32
    %c0_i32_1 = arith.constant 0 : i32
    return %c0_i32, %c0_i32_0 : i32, i32
  }
  func.func @transform_2(%arg0: i32) -> (i32, i32) {
    %c0_i32 = arith.constant 0 : i32
    %c0_i32_0 = arith.constant 0 : i32
    %c0_i32_1 = arith.constant 0 : i32
    return %c0_i32, %c0_i32_0 : i32, i32
  }
  func.func @transform_3(%arg0: i32) -> (i32, i32) {
    %c0_i32 = arith.constant 0 : i32
    %c0_i32_0 = arith.constant 0 : i32
    %c0_i32_1 = arith.constant 0 : i32
    return %c0_i32, %c0_i32_0 : i32, i32
  }
  func.func @transform_4(%arg0: i32) -> (i32, i32) {
    %c0_i32 = arith.constant 0 : i32
    %c0_i32_0 = arith.constant 0 : i32
    %c0_i32_1 = arith.constant 0 : i32
    return %c0_i32, %c0_i32_0 : i32, i32
  }
  func.func @transform_5(%arg0: i32) -> (i32, i32) {
    %c0_i32 = arith.constant 0 : i32
    %c0_i32_0 = arith.constant 0 : i32
    return %arg0, %c0_i32 : i32, i32
  }
}

</mosaic_0001>

<bundles_post_ra>
// kernel: mlp_cmnist_forward.1
= control target key start
LH: loop header
LB: loop body
LE: loop exit
PB: predicated region body
PF: predicated region fallthrough
CT: control target
= control target key end

     0   :  { %10 = vsyncpa [#allocation3], 0  ;;  %s1777_s0 = inlined_call_operand.vmem [shape: f32[8,392], index: 0, kind: input, shape index: {}]   ;;  %s1778_s1 = inlined_call_operand.hbm [shape: f32[392,512], index: 1, kind: input, shape index: {}]   ;;  %s1779_s2 = inlined_call_operand.vmem [shape: f32[1,512], index: 2, kind: input, shape index: {}]   ;;  %s1780_s3 = inlined_call_operand.hbm [shape: f32[512,512], index: 3, kind: input, shape index: {}]   ;;  %s1781_s4 = inlined_call_operand.vmem [shape: f32[1,512], index: 4, kind: input, shape index: {}]   ;;  %s1782_s5 = inlined_call_operand.vmem [shape: f32[8,512], index: 5, kind: output, shape index: {}]  }
   0x1   :  { %11 = vsyncpa [#allocation5], 0  ;;  %s1656_s18 = smov [#allocation2]   ;;  %s1608_s22 = scalar_lea.hbm %s1778_s1, 25088 }
   0x2   :  { %s19_s19 = sshll.u32 %s1656_s18, 4  ;;  %p1609_p0 = scmp.ne.s32.totalorder %s1778_s1, %s1608_s22  ;;  %s20_s19 = int_to_ptr.vmem [resolvable:$true] %s19_s19 }
   0x3   :  { %p1612_p1 = scmp.lt.u32.totalorder %s1608_s22, %s1778_s1 }
   0x5   :  { %p1614_p2 = pnand %p1612_p1, %p1609_p0 }
   0x7   :  { %1617 = shalt.err (!%p1614_p2)
}
   0x8   :  { %s1618_s27 = scalar_lea.vmem %s20_s19, 25088  ;;  %p1623_p4 = scmp.lt.s32.totalorder %s20_s19, %s20_s19 }
   0x9   :  { %p1619_p3 = scmp.ne.s32.totalorder %s20_s19, %s1618_s27  ;;  %p1624_p5 = scmp.lt.s32.totalorder %s1618_s27, %s1618_s27 }
   0xb   :  { %p1625_p6 = por %p1624_p5, %p1623_p4 }
   0xd   :  { %p1626_p7 = pnand %p1625_p6, %p1619_p3 }
   0xf   :  { %1629 = shalt.err (!%p1626_p7)
}
  0x10   :  { %s1657_s28 = smov 512   ;;  %s1658_s29 = smov 32  }
  0x11   :  { %25 = dma.hbm_to_vmem [thread:$0]  %s1778_s1, 25088, %s20_s19, [#allocation3], %s1657_s28, %s1657_s28, %s1658_s29  }
  0x12   :  { %s1659_s7 = smov [#allocation4]   ;;  %s1630_s11 = scalar_lea.hbm %s1780_s3, 32768 }
  0x13   :  { %s33_s8 = sshll.u32 %s1659_s7, 4  ;;  %p1631_p8 = scmp.ne.s32.totalorder %s1780_s3, %s1630_s11  ;;  %s34_s8 = int_to_ptr.vmem [resolvable:$true] %s33_s8 }
  0x14   :  { %p1634_p9 = scmp.lt.u32.totalorder %s1630_s11, %s1780_s3 }
  0x16   :  { %p1636_p10 = pnand %p1634_p9, %p1631_p8 }
  0x18   :  { %1639 = shalt.err (!%p1636_p10)
}
  0x19   :  { %s1640_s16 = scalar_lea.vmem %s34_s8, 32768  ;;  %p1645_p12 = scmp.lt.s32.totalorder %s34_s8, %s34_s8 }
  0x1a   :  { %p1641_p11 = scmp.ne.s32.totalorder %s34_s8, %s1640_s16  ;;  %p1646_p13 = scmp.lt.s32.totalorder %s1640_s16, %s1640_s16 }
  0x1c   :  { %p1647_p0 = por %p1646_p13, %p1645_p12 }
  0x1e   :  { %p1648_p1 = pnand %p1647_p0, %p1641_p11 }
  0x20   :  { %1651 = shalt.err (!%p1648_p1)
}
  0x21   :  { %39 = dma.hbm_to_vmem [thread:$0]  %s1780_s3, 32768, %s34_s8, [#allocation5], %s1657_s28, %s1657_s28, %s1658_s29  }
  0x22   :  { %1652 = dma.done.wait [#allocation3], 25088  }
  0x23   :  { %1653 = vsyncadd [#allocation3], 4294942208 }
  0x24   :  { %1654 = dma.done.wait [#allocation5], 32768  }
  0x25   :  { %1655 = vsyncadd [#allocation5], 4294934528  ;;  %v53_v0 = vld [vmem:[#allocation2 + $0x8] sm:$0xff]  ;;  %v52_v2 = vld [vmem:[#allocation2] sm:$0xff]  ;;  %vm270_vm0 = vcmask 64512  }
  0x26   :  { %v57_v1 = vld [vmem:[#allocation2 + $0x28] sm:$0xff]  ;;  %v56_v4 = vld [vmem:[#allocation2 + $0x20] sm:$0xff]  ;;  %v55_v25 = vld [vmem:[#allocation2 + $0x18] sm:$0xff] }
  0x27   :  { %v1140_v3 = vpack.c.bf16 %v57_v1, %v53_v0  ;;  %v61_v5 = vld [vmem:[#allocation2 + $0x48] sm:$0xff]  ;;  %v1142_v7 = vpack.c.bf16 %v56_v4, %v52_v2  ;;  %v60_v9 = vld [vmem:[#allocation2 + $0x40] sm:$0xff]  ;;  %v59_v26 = vld [vmem:[#allocation2 + $0x38] sm:$0xff] }
  0x28   :  { %v65_v6 = vld [vmem:[#allocation2 + $0x68] sm:$0xff]  ;;  %v64_v10 = vld [vmem:[#allocation2 + $0x60] sm:$0xff]  ;;  %v54_v27 = vld [vmem:[#allocation2 + $0x10] sm:$0xff]  ;;  %v1236_v32 = vpack.c.bf16 %v59_v26, %v55_v25 }
  0x29   :  { %v1144_v8 = vpack.c.bf16 %v65_v6, %v61_v5  ;;  %v69_v11 = vld [vmem:[#allocation2 + $0x88] sm:$0xff]  ;;  %1141 = vmatprep.subr.bf16.mxu0 %v1140_v3  ;;  %v1146_v13 = vpack.c.bf16 %v64_v10, %v60_v9  ;;  %v68_v15 = vld [vmem:[#allocation2 + $0x80] sm:$0xff]  ;;  %v58_v28 = vld [vmem:[#allocation2 + $0x30] sm:$0xff] }
  0x2a   :  { %v73_v12 = vld [vmem:[#allocation2 + $0xa8] sm:$0xff]  ;;  %1143 = vmatpush1.bf16.msra.mxu0 %v1142_v7  ;;  %v72_v16 = vld [vmem:[#allocation2 + $0xa0] sm:$0xff]  ;;  %v1238_v33 = vpack.c.bf16 %v58_v28, %v54_v27  ;;  %v63_v36 = vld [vmem:[#allocation2 + $0x58] sm:$0xff]  ;;  %1237 = vmatprep.subr.bf16.mxu1 %v1236_v32 }
  0x2b   :  { %1145 = vmatprep.subr.bf16.mxu0 %v1144_v8  ;;  %v1148_v14 = vpack.c.bf16 %v73_v12, %v69_v11  ;;  %v77_v17 = vld [vmem:[#allocation2 + $0xc8] sm:$0xff]  ;;  %v1150_v19 = vpack.c.bf16 %v72_v16, %v68_v15  ;;  %v76_v21 = vld [vmem:[#allocation2 + $0xc0] sm:$0xff]  ;;  %v67_v37 = vld [vmem:[#allocation2 + $0x78] sm:$0xff] }
  0x2c   :  { %v81_v18 = vld [vmem:[#allocation2 + $0xe8] sm:$0xff]  ;;  %v80_v22 = vld [vmem:[#allocation2 + $0xe0] sm:$0xff]  ;;  %v1240_v39 = vpack.c.bf16 %v67_v37, %v63_v36  ;;  %v62_v40 = vld [vmem:[#allocation2 + $0x50] sm:$0xff]  ;;  %1239 = vmatpush1.bf16.msra.mxu1 %v1238_v33 }
  0x2d   :  { %v1152_v20 = vpack.c.bf16 %v81_v18, %v77_v17  ;;  %v85_v23 = vld [vmem:[#allocation2 + $0x108] sm:$0xff]  ;;  %v1154_v29 = vpack.c.bf16 %v80_v22, %v76_v21  ;;  %v84_v30 = vld [vmem:[#allocation2 + $0x100] sm:$0xff]  ;;  %v66_v41 = vld [vmem:[#allocation2 + $0x70] sm:$0xff] }
  0x2e   :  { %1147 = vmatpush1.bf16.msra.mxu0 %v1146_v13  ;;  %v89_v24 = vld [vmem:[#allocation2 + $0x128] sm:$0xff]  ;;  %v88_v31 = vld [vmem:[#allocation2 + $0x120] sm:$0xff]  ;;  %v1242_v42 = vpack.c.bf16 %v66_v41, %v62_v40  ;;  %1241 = vmatprep.subr.bf16.mxu1 %v1240_v39  ;;  %v71_v44 = vld [vmem:[#allocation2 + $0x98] sm:$0xff] }
  0x2f   :  { %1149 = vmatprep.subr.bf16.mxu0 %v1148_v14  ;;  %v1156_v34 = vpack.c.bf16 %v89_v24, %v85_v23  ;;  %v93_v35 = vld [vmem:[#allocation2 + $0x148] sm:$0xff]  ;;  %v1158_v43 = vpack.c.bf16 %v88_v31, %v84_v30  ;;  %v75_v45 = vld [vmem:[#allocation2 + $0xb8] sm:$0xff]  ;;  %v70_v46 = vld [vmem:[#allocation2 + $0x90] sm:$0xff] }
  0x30   :  { %v97_v38 = vld [vmem:[#allocation2 + $0x168] sm:$0xff]  ;;  %v92_v48 = vld [vmem:[#allocation2 + $0x140] sm:$0xff]  ;;  %v1244_v50 = vpack.c.bf16 %v75_v45, %v71_v44  ;;  %v74_v51 = vld [vmem:[#allocation2 + $0xb0] sm:$0xff]  ;;  %1243 = vmatpush1.bf16.msra.mxu1 %v1242_v42 }
  0x31   :  { %v1160_v47 = vpack.c.bf16 %v97_v38, %v93_v35  ;;  %v96_v49 = vld [vmem:[#allocation2 + $0x160] sm:$0xff]  ;;  %v101_v52 = vld [vmem:[#allocation2 + $0x188] sm:$0xff]  ;;  %v79_v54 = vld [vmem:[#allocation2 + $0xd8] sm:$0xff]  ;;  %v1246_v55 = vpack.c.bf16 %v74_v51, %v70_v46 }
  0x32   :  { %1151 = vmatpush1.bf16.msra.mxu0 %v1150_v19  ;;  %v105_v53 = vld [vmem:[#allocation2 + $0x1a8] sm:$0xff]  ;;  %v83_v56 = vld [vmem:[#allocation2 + $0xf8] sm:$0xff]  ;;  %v1162_v57 = vpack.c.bf16 %v96_v49, %v92_v48  ;;  %v100_v58 = vld [vmem:[#allocation2 + $0x180] sm:$0xff]  ;;  %1245 = vmatprep.subr.bf16.mxu1 %v1244_v50 }
  0x33   :  { %1153 = vmatprep.subr.bf16.mxu0 %v1152_v20  ;;  %v1248_v59 = vpack.c.bf16 %v83_v56, %v79_v54  ;;  %v78_v60 = vld [vmem:[#allocation2 + $0xd0] sm:$0xff]  ;;  %v1164_v62 = vpack.c.bf16 %v105_v53, %v101_v52  ;;  %v104_v63 = vld [vmem:[#allocation2 + $0x1a0] sm:$0xff]  ;;  %v87_v0 = vld [vmem:[#allocation2 + $0x118] sm:$0xff] }
  0x34   :  { %v82_v61 = vld [vmem:[#allocation2 + $0xf0] sm:$0xff]  ;;  %v91_v1 = vld [vmem:[#allocation2 + $0x138] sm:$0xff]  ;;  %v109_v2 = vld [vmem:[#allocation2 + $0x1c8] sm:$0xff]  ;;  %1247 = vmatpush1.bf16.msra.mxu1 %v1246_v55  ;;  %v1166_v5 = vpack.c.bf16 %v104_v63, %v100_v58 }
  0x35   :  { %v113_v3 = vld [vmem:[#allocation2 + $0x1e8] sm:$0xff]  ;;  %v1250_v4 = vpack.c.bf16 %v82_v61, %v78_v60  ;;  %v108_v6 = vld [vmem:[#allocation2 + $0x1c0] sm:$0xff]  ;;  %1249 = vmatprep.subr.bf16.mxu1 %v1248_v59  ;;  %v1252_v7 = vpack.c.bf16 %v91_v1, %v87_v0  ;;  %v86_v8 = vld [vmem:[#allocation2 + $0x110] sm:$0xff] }
  0x36   :  { %1155 = vmatpush1.bf16.msra.mxu0 %v1154_v29  ;;  %v90_v9 = vld [vmem:[#allocation2 + $0x130] sm:$0xff]  ;;  %v1168_v10 = vpack.c.bf16 %v113_v3, %v109_v2  ;;  %v112_v11 = vld [vmem:[#allocation2 + $0x1e0] sm:$0xff]  ;;  %v95_v12 = vld [vmem:[#allocation2 + $0x158] sm:$0xff] }
  0x37   :  { %1157 = vmatprep.subr.bf16.mxu0 %v1156_v34  ;;  %v99_v13 = vld [vmem:[#allocation2 + $0x178] sm:$0xff]  ;;  %v117_v14 = vld [vmem:[#allocation2 + $0x208] sm:$0xff]  ;;  %v1254_v16 = vpack.c.bf16 %v90_v9, %v86_v8  ;;  %v1170_v17 = vpack.c.bf16 %v112_v11, %v108_v6  ;;  %v116_v18 = vld [vmem:[#allocation2 + $0x200] sm:$0xff] }
  0x38   :  { %v121_v15 = vld [vmem:[#allocation2 + $0x228] sm:$0xff]  ;;  %1251 = vmatpush1.bf16.msra.mxu1 %v1250_v4  ;;  %v1256_v19 = vpack.c.bf16 %v99_v13, %v95_v12  ;;  %v94_v20 = vld [vmem:[#allocation2 + $0x150] sm:$0xff]  ;;  %v120_v23 = vld [vmem:[#allocation2 + $0x220] sm:$0xff] }
  0x39   :  { %1253 = vmatprep.subr.bf16.mxu1 %v1252_v7  ;;  %v98_v21 = vld [vmem:[#allocation2 + $0x170] sm:$0xff]  ;;  %v1172_v22 = vpack.c.bf16 %v121_v15, %v117_v14  ;;  %v103_v24 = vld [vmem:[#allocation2 + $0x198] sm:$0xff]  ;;  %v125_v26 = vld [vmem:[#allocation2 + $0x248] sm:$0xff]  ;;  %v1174_v30 = vpack.c.bf16 %v120_v23, %v116_v18 }
  0x3a   :  { %1159 = vmatpush1.bf16.msra.mxu0 %v1158_v43  ;;  %v107_v25 = vld [vmem:[#allocation2 + $0x1b8] sm:$0xff]  ;;  %v129_v27 = vld [vmem:[#allocation2 + $0x268] sm:$0xff]  ;;  %v124_v28 = vld [vmem:[#allocation2 + $0x240] sm:$0xff]  ;;  %v1258_v29 = vpack.c.bf16 %v98_v21, %v94_v20 }
  0x3b   :  { %1161 = vmatprep.subr.bf16.mxu0 %v1160_v47  ;;  %v128_v31 = vld [vmem:[#allocation2 + $0x260] sm:$0xff]  ;;  %v1260_v32 = vpack.c.bf16 %v107_v25, %v103_v24  ;;  %v102_v33 = vld [vmem:[#allocation2 + $0x190] sm:$0xff]  ;;  %v1176_v35 = vpack.c.bf16 %v129_v27, %v125_v26  ;;  %v111_v36 = vld [vmem:[#allocation2 + $0x1d8] sm:$0xff] }
  0x3c   :  { %1255 = vmatpush1.bf16.msra.mxu1 %v1254_v16  ;;  %v106_v34 = vld [vmem:[#allocation2 + $0x1b0] sm:$0xff]  ;;  %v115_v37 = vld [vmem:[#allocation2 + $0x1f8] sm:$0xff]  ;;  %v49_v38 = vld [vmem:[%s1777_s0 + $0x8] sm:$0xff]  ;;  %v1178_v42 = vpack.c.bf16 %v128_v31, %v124_v28 }
  0x3d   :  { %1257 = vmatprep.subr.bf16.mxu1 %v1256_v19  ;;  %v133_v39 = vld [vmem:[#allocation2 + $0x288] sm:$0xff]  ;;  %338 = vmatprep.mubr.f32.mxu0 %v49_v38  ;;  %v1262_v41 = vpack.c.bf16 %v106_v34, %v102_v33  ;;  %v132_v43 = vld [vmem:[#allocation2 + $0x280] sm:$0xff]  ;;  %v1264_v44 = vpack.c.bf16 %v115_v37, %v111_v36  ;;  %v110_v45 = vld [vmem:[#allocation2 + $0x1d0] sm:$0xff] }
  0x3e   :  { %1163 = vmatpush1.bf16.msra.mxu0 %v1162_v57  ;;  %v137_v40 = vld [vmem:[#allocation2 + $0x2a8] sm:$0xff]  ;;  %480 = vmatprep.mubr.f32.mxu1 %v49_v38  ;;  %v114_v46 = vld [vmem:[#allocation2 + $0x1f0] sm:$0xff]  ;;  %v136_v48 = vld [vmem:[#allocation2 + $0x2a0] sm:$0xff] }
  0x3f   :  { %1165 = vmatprep.subr.bf16.mxu0 %v1164_v62  ;;  %v1180_v47 = vpack.c.bf16 %v137_v40, %v133_v39  ;;  %v119_v49 = vld [vmem:[#allocation2 + $0x218] sm:$0xff]  ;;  %v141_v51 = vld [vmem:[#allocation2 + $0x2c8] sm:$0xff]  ;;  %v1266_v53 = vpack.c.bf16 %v114_v46, %v110_v45  ;;  %v1182_v54 = vpack.c.bf16 %v136_v48, %v132_v43  ;;  %v140_v55 = vld [vmem:[#allocation2 + $0x2c0] sm:$0xff] }
  0x40   :  { %1259 = vmatpush1.bf16.msra.mxu1 %v1258_v29  ;;  %v123_v50 = vld [vmem:[#allocation2 + $0x238] sm:$0xff]  ;;  %v145_v52 = vld [vmem:[#allocation2 + $0x2e8] sm:$0xff]  ;;  %v118_v57 = vld [vmem:[#allocation2 + $0x210] sm:$0xff] }
  0x41   :  { %1261 = vmatprep.subr.bf16.mxu1 %v1260_v32  ;;  %v1268_v56 = vpack.c.bf16 %v123_v50, %v119_v49  ;;  %v122_v58 = vld [vmem:[#allocation2 + $0x230] sm:$0xff]  ;;  %v1184_v59 = vpack.c.bf16 %v145_v52, %v141_v51  ;;  %v144_v60 = vld [vmem:[#allocation2 + $0x2e0] sm:$0xff]  ;;  %v127_v61 = vld [vmem:[#allocation2 + $0x258] sm:$0xff] }
  0x42   :  { %1167 = vmatpush1.bf16.msra.mxu0 %v1166_v5  ;;  %v131_v62 = vld [vmem:[#allocation2 + $0x278] sm:$0xff]  ;;  %v149_v63 = vld [vmem:[#allocation2 + $0x308] sm:$0xff]  ;;  %v1270_v1 = vpack.c.bf16 %v122_v58, %v118_v57  ;;  %v1186_v2 = vpack.c.bf16 %v144_v60, %v140_v55  ;;  %v148_v3 = vld [vmem:[#allocation2 + $0x300] sm:$0xff] }
  0x43   :  { %1169 = vmatprep.subr.bf16.mxu0 %v1168_v10  ;;  %v153_v0 = vld [vmem:[#allocation2 + $0x328] sm:$0xff]  ;;  %v1272_v4 = vpack.c.bf16 %v131_v62, %v127_v61  ;;  %v126_v5 = vld [vmem:[#allocation2 + $0x250] sm:$0xff]  ;;  %v152_v8 = vld [vmem:[#allocation2 + $0x320] sm:$0xff] }
  0x44   :  { %1263 = vmatpush1.bf16.msra.mxu1 %v1262_v41  ;;  %v130_v6 = vld [vmem:[#allocation2 + $0x270] sm:$0xff]  ;;  %v1188_v7 = vpack.c.bf16 %v153_v0, %v149_v63  ;;  %v135_v9 = vld [vmem:[#allocation2 + $0x298] sm:$0xff]  ;;  %v157_v11 = vld [vmem:[#allocation2 + $0x348] sm:$0xff]  ;;  %v1190_v14 = vpack.c.bf16 %v152_v8, %v148_v3 }
  0x45   :  { %1265 = vmatprep.subr.bf16.mxu1 %v1264_v44  ;;  %v139_v10 = vld [vmem:[#allocation2 + $0x2b8] sm:$0xff]  ;;  %v161_v12 = vld [vmem:[#allocation2 + $0x368] sm:$0xff]  ;;  %v1274_v13 = vpack.c.bf16 %v130_v6, %v126_v5  ;;  %v156_v15 = vld [vmem:[#allocation2 + $0x340] sm:$0xff] }
  0x46   :  { %1171 = vmatpush1.bf16.msra.mxu0 %v1170_v17  ;;  %v1276_v16 = vpack.c.bf16 %v139_v10, %v135_v9  ;;  %v134_v17 = vld [vmem:[#allocation2 + $0x290] sm:$0xff]  ;;  %v1192_v19 = vpack.c.bf16 %v161_v12, %v157_v11  ;;  %v160_v20 = vld [vmem:[#allocation2 + $0x360] sm:$0xff]  ;;  %v143_v21 = vld [vmem:[#allocation2 + $0x2d8] sm:$0xff] }
  0x47   :  { %1173 = vmatprep.subr.bf16.mxu0 %v1172_v22  ;;  %v138_v18 = vld [vmem:[#allocation2 + $0x2b0] sm:$0xff]  ;;  %v147_v22 = vld [vmem:[#allocation2 + $0x2f8] sm:$0xff]  ;;  %v165_v23 = vld [vmem:[#allocation2 + $0x388] sm:$0xff]  ;;  %v1194_v26 = vpack.c.bf16 %v160_v20, %v156_v15 }
  0x48   :  { %1267 = vmatpush1.bf16.msra.mxu1 %v1266_v53  ;;  %v169_v24 = vld [vmem:[#allocation2 + $0x3a8] sm:$0xff]  ;;  %v1278_v25 = vpack.c.bf16 %v138_v18, %v134_v17  ;;  %v164_v27 = vld [vmem:[#allocation2 + $0x380] sm:$0xff]  ;;  %v1280_v28 = vpack.c.bf16 %v147_v22, %v143_v21  ;;  %v142_v29 = vld [vmem:[#allocation2 + $0x2d0] sm:$0xff] }
  0x49   :  { %1269 = vmatprep.subr.bf16.mxu1 %v1268_v56  ;;  %v1196_v31 = vpack.c.bf16 %v169_v24, %v165_v23  ;;  %v168_v32 = vld [vmem:[#allocation2 + $0x3a0] sm:$0xff]  ;;  %v151_v33 = vld [vmem:[#allocation2 + $0x318] sm:$0xff]  ;;  %v177_v36 = vld [vmem:[#allocation2 + $0x3e8] sm:$0xff] }
  0x4a   :  { %1175 = vmatpush1.bf16.msra.mxu0 %v1174_v30  ;;  %v146_v30 = vld [vmem:[#allocation2 + $0x2f0] sm:$0xff]  ;;  %v155_v34 = vld [vmem:[#allocation2 + $0x338] sm:$0xff]  ;;  %v1198_v38 = vpack.c.bf16 %v168_v32, %v164_v27  ;;  %v172_v39 = vld [vmem:[#allocation2 + $0x3c0] sm:$0xff] }
  0x4b   :  { %1177 = vmatprep.subr.bf16.mxu0 %v1176_v35  ;;  %v173_v35 = vld [vmem:[#allocation2 + $0x3c8] sm:$0xff]  ;;  %v1282_v37 = vpack.c.bf16 %v146_v30, %v142_v29  ;;  %v1284_v40 = vpack.c.bf16 %v155_v34, %v151_v33  ;;  %v150_v41 = vld [vmem:[#allocation2 + $0x310] sm:$0xff]  ;;  %v176_v44 = vld [vmem:[#allocation2 + $0x3e0] sm:$0xff] }
  0x4c   :  { %1271 = vmatpush1.bf16.msra.mxu1 %v1270_v1  ;;  %v1200_v43 = vpack.c.bf16 %v177_v36, %v173_v35  ;;  %v159_v45 = vld [vmem:[#allocation2 + $0x358] sm:$0xff]  ;;  %v185_v48 = vld [vmem:[#allocation2 + $0x428] sm:$0xff]  ;;  %v1202_v50 = vpack.c.bf16 %v176_v44, %v172_v39  ;;  %v180_v51 = vld [vmem:[#allocation2 + $0x400] sm:$0xff] }
  0x4d   :  { %1273 = vmatprep.subr.bf16.mxu1 %v1272_v4  ;;  %v163_v46 = vld [vmem:[#allocation2 + $0x378] sm:$0xff]  ;;  %v158_v53 = vld [vmem:[#allocation2 + $0x350] sm:$0xff]  ;;  %v184_v56 = vld [vmem:[#allocation2 + $0x420] sm:$0xff] }
  0x4e   :  { %1179 = vmatpush1.bf16.msra.mxu0 %v1178_v42  ;;  %v154_v42 = vld [vmem:[#allocation2 + $0x330] sm:$0xff]  ;;  %v1288_v52 = vpack.c.bf16 %v163_v46, %v159_v45  ;;  %v167_v57 = vld [vmem:[#allocation2 + $0x398] sm:$0xff]  ;;  %v193_v60 = vld [vmem:[#allocation2 + $0x468] sm:$0xff]  ;;  %v1206_v63 = vpack.c.bf16 %v184_v56, %v180_v51 }
  0x4f   :  { %1181 = vmatprep.subr.bf16.mxu0 %v1180_v47  ;;  %v181_v47 = vld [vmem:[#allocation2 + $0x408] sm:$0xff]  ;;  %v1286_v49 = vpack.c.bf16 %v154_v42, %v150_v41  ;;  %v171_v58 = vld [vmem:[#allocation2 + $0x3b8] sm:$0xff]  ;;  %v1720_v61 = vld [vmem:[%s1777_s0] sm:$0xff] }
  0x50   :  { %1275 = vmatpush1.bf16.msra.mxu1 %v1274_v13  ;;  %v1204_v55 = vpack.c.bf16 %v185_v48, %v181_v47  ;;  %v188_v0 = vld [vmem:[#allocation2 + $0x440] sm:$0xff]  ;;  %v1292_v1 = vpack.c.bf16 %v171_v58, %v167_v57  ;;  %v170_v3 = vld [vmem:[#allocation2 + $0x3b0] sm:$0xff]  ;;  %v175_v6 = vld [vmem:[#allocation2 + $0x3d8] sm:$0xff] }
  0x51   :  { %1277 = vmatprep.subr.bf16.mxu1 %v1276_v16  ;;  %v192_v5 = vld [vmem:[#allocation2 + $0x460] sm:$0xff]  ;;  %v197_v8 = vld [vmem:[#allocation2 + $0x488] sm:$0xff]  ;;  %v51_v10 = vld [vmem:[%s1777_s0 + $0x18] sm:$0xff] }
  0x52   :  { %1183 = vmatpush1.bf16.msra.mxu0 %v1182_v54  ;;  %v162_v54 = vld [vmem:[#allocation2 + $0x370] sm:$0xff]  ;;  %v201_v9 = vld [vmem:[#allocation2 + $0x4a8] sm:$0xff]  ;;  %v1210_v12 = vpack.c.bf16 %v192_v5, %v188_v0  ;;  %v196_v13 = vld [vmem:[#allocation2 + $0x480] sm:$0xff] }
  0x53   :  { %1185 = vmatprep.subr.bf16.mxu0 %v1184_v59  ;;  %v189_v59 = vld [vmem:[#allocation2 + $0x448] sm:$0xff]  ;;  %v1290_v62 = vpack.c.bf16 %v162_v54, %v158_v53  ;;  %v174_v15 = vld [vmem:[#allocation2 + $0x3d0] sm:$0xff]  ;;  %v1212_v17 = vpack.c.bf16 %v201_v9, %v197_v8  ;;  %v200_v18 = vld [vmem:[#allocation2 + $0x4a0] sm:$0xff] }
  0x54   :  { %1279 = vmatpush1.bf16.msra.mxu1 %v1278_v25  ;;  %v1208_v4 = vpack.c.bf16 %v193_v60, %v189_v59  ;;  %v178_v16 = vld [vmem:[#allocation2 + $0x3f0] sm:$0xff]  ;;  %v187_v20 = vld [vmem:[#allocation2 + $0x438] sm:$0xff]  ;;  %v205_v21 = vld [vmem:[#allocation2 + $0x4c8] sm:$0xff]  ;;  %v1214_v24 = vpack.c.bf16 %v200_v18, %v196_v13 }
  0x55   :  { %1281 = vmatprep.subr.bf16.mxu1 %v1280_v28  ;;  %v209_v22 = vld [vmem:[#allocation2 + $0x4e8] sm:$0xff]  ;;  %v1298_v23 = vpack.c.bf16 %v178_v16, %v174_v15  ;;  %v204_v25 = vld [vmem:[#allocation2 + $0x4c0] sm:$0xff]  ;;  %v182_v27 = vld [vmem:[#allocation2 + $0x410] sm:$0xff] }
  0x56   :  { %1187 = vmatpush1.bf16.msra.mxu0 %v1186_v2  ;;  %v166_v2 = vld [vmem:[#allocation2 + $0x390] sm:$0xff]  ;;  %v1216_v29 = vpack.c.bf16 %v209_v22, %v205_v21  ;;  %v208_v30 = vld [vmem:[#allocation2 + $0x4e0] sm:$0xff]  ;;  %v195_v32 = vld [vmem:[#allocation2 + $0x478] sm:$0xff] }
  0x57   :  { %1189 = vmatprep.subr.bf16.mxu0 %v1188_v7  ;;  %v179_v7 = vld [vmem:[#allocation2 + $0x3f8] sm:$0xff]  ;;  %v1294_v11 = vpack.c.bf16 %v170_v3, %v166_v2  ;;  %v186_v28 = vld [vmem:[#allocation2 + $0x430] sm:$0xff]  ;;  %v213_v33 = vld [vmem:[#allocation2 + $0x508] sm:$0xff]  ;;  %v1218_v36 = vpack.c.bf16 %v208_v30, %v204_v25 }
  0x58   :  { %1283 = vmatpush1.bf16.msra.mxu1 %v1282_v37  ;;  %v217_v34 = vld [vmem:[#allocation2 + $0x528] sm:$0xff]  ;;  %v1302_v35 = vpack.c.bf16 %v186_v28, %v182_v27  ;;  %v212_v37 = vld [vmem:[#allocation2 + $0x500] sm:$0xff]  ;;  %v190_v39 = vld [vmem:[#allocation2 + $0x450] sm:$0xff] }
  0x59   :  { %1285 = vmatprep.subr.bf16.mxu1 %v1284_v40  ;;  %v194_v40 = vld [vmem:[#allocation2 + $0x470] sm:$0xff]  ;;  %v1220_v41 = vpack.c.bf16 %v217_v34, %v213_v33  ;;  %v216_v42 = vld [vmem:[#allocation2 + $0x520] sm:$0xff]  ;;  %v203_v44 = vld [vmem:[#allocation2 + $0x4b8] sm:$0xff] }
  0x5a   :  { %1191 = vmatpush1.bf16.msra.mxu0 %v1190_v14  ;;  %v1296_v14 = vpack.c.bf16 %v179_v7, %v175_v6  ;;  %v221_v45 = vld [vmem:[#allocation2 + $0x548] sm:$0xff]  ;;  %v1306_v47 = vpack.c.bf16 %v194_v40, %v190_v39  ;;  %v1222_v48 = vpack.c.bf16 %v216_v42, %v212_v37  ;;  %v198_v51 = vld [vmem:[#allocation2 + $0x490] sm:$0xff]  ;;  %v224_v54 = vld [vmem:[#allocation2 + $0x560] sm:$0xff] }
  0x5b   :  { %1193 = vmatprep.subr.bf16.mxu0 %v1192_v19  ;;  %v183_v19 = vld [vmem:[#allocation2 + $0x418] sm:$0xff]  ;;  %v225_v46 = vld [vmem:[#allocation2 + $0x568] sm:$0xff]  ;;  %v210_v0 = vld [vmem:[#allocation2 + $0x4f0] sm:$0xff] }
  0x5c   :  { %1287 = vmatpush1.bf16.msra.mxu1 %v1286_v49  ;;  %v220_v49 = vld [vmem:[#allocation2 + $0x540] sm:$0xff]  ;;  %v1224_v53 = vpack.c.bf16 %v225_v46, %v221_v45  ;;  %v211_v56 = vld [vmem:[#allocation2 + $0x4f8] sm:$0xff]  ;;  %v229_v57 = vld [vmem:[#allocation2 + $0x588] sm:$0xff] }
  0x5d   :  { %1289 = vmatprep.subr.bf16.mxu1 %v1288_v52  ;;  %v202_v52 = vld [vmem:[#allocation2 + $0x4b0] sm:$0xff]  ;;  %v233_v58 = vld [vmem:[#allocation2 + $0x5a8] sm:$0xff]  ;;  %v1226_v60 = vpack.c.bf16 %v224_v54, %v220_v49  ;;  %v232_v2 = vld [vmem:[#allocation2 + $0x5a0] sm:$0xff] }
  0x5e   :  { %1195 = vmatpush1.bf16.msra.mxu0 %v1194_v26  ;;  %v1300_v26 = vpack.c.bf16 %v187_v20, %v183_v19  ;;  %v1310_v59 = vpack.c.bf16 %v202_v52, %v198_v51  ;;  %v215_v3 = vld [vmem:[#allocation2 + $0x518] sm:$0xff]  ;;  %v237_v5 = vld [vmem:[#allocation2 + $0x5c8] sm:$0xff]  ;;  %v236_v9 = vld [vmem:[#allocation2 + $0x5c0] sm:$0xff] }
  0x5f   :  { %1197 = vmatprep.subr.bf16.mxu0 %v1196_v31  ;;  %v191_v31 = vld [vmem:[#allocation2 + $0x458] sm:$0xff]  ;;  %v241_v6 = vld [vmem:[#allocation2 + $0x5e8] sm:$0xff]  ;;  %v222_v20 = vld [vmem:[#allocation2 + $0x550] sm:$0xff] }
  0x60   :  { %1291 = vmatpush1.bf16.msra.mxu1 %v1290_v62  ;;  %v1232_v13 = vpack.c.bf16 %v241_v6, %v237_v5  ;;  %v223_v15 = vld [vmem:[#allocation2 + $0x558] sm:$0xff]  ;;  %v226_v21 = vld [vmem:[#allocation2 + $0x570] sm:$0xff]  ;;  %v563_v25 = vld [vmem:[#allocation4 + $0x8] sm:$0xff] }
  0x61   :  { %1293 = vmatprep.subr.bf16.mxu1 %v1292_v1  ;;  %v1228_v1 = vpack.c.bf16 %v233_v58, %v229_v57  ;;  %v227_v16 = vld [vmem:[#allocation2 + $0x578] sm:$0xff]  ;;  %v1322_v27 = vpack.c.bf16 %v226_v21, %v222_v20  ;;  %v230_v28 = vld [vmem:[#allocation2 + $0x590] sm:$0xff]  ;;  %v566_v30 = vld [vmem:[#allocation4 + $0x20] sm:$0xff] }
  0x62   :  { %1199 = vmatpush1.bf16.msra.mxu0 %v1198_v38  ;;  %v1304_v38 = vpack.c.bf16 %v195_v32, %v191_v31  ;;  %v1320_v19 = vpack.c.bf16 %v227_v16, %v223_v15  ;;  %v231_v22 = vld [vmem:[#allocation2 + $0x598] sm:$0xff]  ;;  %v234_v32 = vld [vmem:[#allocation2 + $0x5b0] sm:$0xff]  ;;  %v571_v33 = vld [vmem:[#allocation4 + $0x48] sm:$0xff] }
  0x63   :  { %1201 = vmatprep.subr.bf16.mxu0 %v1200_v43  ;;  %v199_v43 = vld [vmem:[#allocation2 + $0x498] sm:$0xff]  ;;  %v575_v34 = vld [vmem:[#allocation4 + $0x68] sm:$0xff]  ;;  %v50_v39 = vld [vmem:[%s1777_s0 + $0x10] sm:$0xff] }
  0x64   :  { %1295 = vmatpush1.bf16.msra.mxu1 %v1294_v11  ;;  %v214_v11 = vld [vmem:[#allocation2 + $0x510] sm:$0xff]  ;;  %v243_v37 = vld [vmem:[#allocation2 + $0x5f8] sm:$0xff]  ;;  %v574_v45 = vld [vmem:[#allocation4 + $0x60] sm:$0xff] }
  0x65   :  { %1297 = vmatprep.subr.bf16.mxu1 %v1296_v14  ;;  %v240_v14 = vld [vmem:[#allocation2 + $0x5e0] sm:$0xff]  ;;  %v238_v42 = vld [vmem:[#allocation2 + $0x5d0] sm:$0xff]  ;;  %v583_v49 = vld [vmem:[#allocation4 + $0xa8] sm:$0xff] }
  0x66   :  { %1203 = vmatpush1.bf16.msra.mxu0 %v1202_v50  ;;  %v1308_v50 = vpack.c.bf16 %v203_v44, %v199_v43  ;;  %v1234_v18 = vpack.c.bf16 %v240_v14, %v236_v9  ;;  %v1336_v43 = vpack.c.bf16 %v575_v34, %v571_v33  ;;  %v570_v44 = vld [vmem:[#allocation4 + $0x40] sm:$0xff]  ;;  %v247_v57 = vld [vmem:[#allocation2 + $0x618] sm:$0xff]  ;;  %v595_v6 = vld [vmem:[#allocation4 + $0x108] sm:$0xff] }
  0x67   :  { %1205 = vmatprep.subr.bf16.mxu0 %v1204_v55  ;;  %v207_v55 = vld [vmem:[#allocation2 + $0x4d8] sm:$0xff]  ;;  %v582_v54 = vld [vmem:[#allocation4 + $0xa0] sm:$0xff]  ;;  %v588_v34 = vld [vmem:[#allocation4 + $0xd0] sm:$0xff] }
  0x68   :  { %1299 = vmatpush1.bf16.msra.mxu1 %v1298_v23  ;;  %v1312_v62 = vpack.c.bf16 %v211_v56, %v207_v55  ;;  %v235_v23 = vld [vmem:[#allocation2 + $0x5b8] sm:$0xff]  ;;  %v587_v55 = vld [vmem:[#allocation4 + $0xc8] sm:$0xff]  ;;  %v594_v16 = vld [vmem:[#allocation4 + $0x100] sm:$0xff] }
  0x69   :  { %339 = vmatmul.mubr.f32.vlgmr.msra.gmra.mrb[0].mxu0 %v1720_v61  ;;  %1301 = vmatprep.subr.bf16.mxu1 %v1300_v26  ;;  %v567_v26 = vld [vmem:[#allocation4 + $0x28] sm:$0xff]  ;;  %v1324_v31 = vpack.c.bf16 %v235_v23, %v231_v22  ;;  %v565_v58 = vld [vmem:[#allocation4 + $0x18] sm:$0xff]  ;;  %v580_v22 = vld [vmem:[#allocation4 + $0x90] sm:$0xff] }
  0x6a   :  { %1207 = vmatpush1.bf16.msra.mxu0 %v1206_v63  ;;  %1138 = vmatprep.mubr.msk.f32.mxu0 %vm270_vm0, %v51_v10  ;;  %v206_v63 = vld [vmem:[#allocation2 + $0x4d0] sm:$0xff]  ;;  %v591_v56 = vld [vmem:[#allocation4 + $0xe8] sm:$0xff]  ;;  %v585_v14 = vld [vmem:[#allocation4 + $0xb8] sm:$0xff] }
  0x6b   :  { %1209 = vmatprep.subr.bf16.mxu0 %v1208_v4  ;;  %481 = vmatmul.mubr.f32.vlgmr.msra.gmra.mrb[0].mxu1 %v1720_v61  ;;  %v228_v61 = vld [vmem:[#allocation2 + $0x580] sm:$0xff]  ;;  %v219_v4 = vld [vmem:[#allocation2 + $0x538] sm:$0xff]  ;;  %v1314_v7 = vpack.c.bf16 %v210_v0, %v206_v63  ;;  %v584_v23 = vld [vmem:[#allocation4 + $0xb0] sm:$0xff] }
  0x6c   :  { %1303 = vmatpush1.bf16.msra.mxu1 %v1302_v35  ;;  %1139 = vmatprep.mubr.msk.f32.mxu1 %vm270_vm0, %v51_v10  ;;  %v1230_v8 = vpack.c.bf16 %v232_v2, %v228_v61  ;;  %v1316_v10 = vpack.c.bf16 %v219_v4, %v215_v3  ;;  %v244_v35 = vld [vmem:[#allocation2 + $0x600] sm:$0xff]  ;;  %v568_v61 = vld [vmem:[#allocation4 + $0x30] sm:$0xff]  ;;  %v577_v0 = vld [vmem:[#allocation4 + $0x78] sm:$0xff] }
  0x6d   :  { %1305 = vmatprep.subr.bf16.mxu1 %v1304_v38  ;;  %v1332_v38 = vpack.c.bf16 %v567_v26, %v563_v25  ;;  %v586_v2 = vld [vmem:[#allocation4 + $0xc0] sm:$0xff]  ;;  %v246_v4 = vld [vmem:[#allocation2 + $0x610] sm:$0xff]  ;;  %v593_v26 = vld [vmem:[#allocation4 + $0xf8] sm:$0xff] }
  0x6e   :  { %1211 = vmatpush1.bf16.msra.mxu0 %v1210_v12  ;;  %v218_v12 = vld [vmem:[#allocation2 + $0x530] sm:$0xff]  ;;  %v590_v3 = vld [vmem:[#allocation4 + $0xe0] sm:$0xff] }
  0x6f   :  { %1213 = vmatprep.subr.bf16.mxu0 %v1212_v17  ;;  %v1318_v17 = vpack.c.bf16 %v218_v12, %v214_v11  ;;  %v576_v11 = vld [vmem:[#allocation4 + $0x70] sm:$0xff]  ;;  %v581_v12 = vld [vmem:[#allocation4 + $0x98] sm:$0xff] }
  0x70   :  { %1307 = vmatpush1.bf16.msra.mxu1 %v1306_v47  ;;  %v242_v47 = vld [vmem:[#allocation2 + $0x5f0] sm:$0xff]  ;;  %v1468_v21 = vpack.c.bf16 %v585_v14, %v581_v12  ;;  %v634_v12 = vld [vmem:[#allocation4 + $0x240] sm:$0xff]  ;;  %v643_v14 = vld [vmem:[#allocation4 + $0x288] sm:$0xff] }
  0x71   :  { %1309 = vmatprep.subr.bf16.mxu1 %v1308_v50  ;;  %v1338_v50 = vpack.c.bf16 %v574_v45, %v570_v44  ;;  %v1330_v51 = vpack.c.bf16 %v242_v47, %v238_v42  ;;  %v619_v42 = vld [vmem:[#allocation4 + $0x1c8] sm:$0xff]  ;;  %v600_v47 = vld [vmem:[#allocation4 + $0x130] sm:$0xff] }
  0x72   :  { %1215 = vmatpush1.bf16.msra.mxu0 %v1214_v24  ;;  %v245_v24 = vld [vmem:[#allocation2 + $0x608] sm:$0xff] }
  0x73   :  { %1217 = vmatprep.subr.bf16.mxu0 %v1216_v29  ;;  %v562_v29 = vld [vmem:[#allocation4] sm:$0xff] }
  0x74   :  { %1311 = vmatpush1.bf16.msra.mxu1 %v1310_v59  ;;  %v1334_v40 = vpack.c.bf16 %v566_v30, %v562_v29  ;;  %v569_v59 = vld [vmem:[#allocation4 + $0x38] sm:$0xff]  ;;  %v606_v29 = vld [vmem:[#allocation4 + $0x160] sm:$0xff]  ;;  %v611_v30 = vld [vmem:[#allocation4 + $0x188] sm:$0xff] }
  0x75   :  { %1313 = vmatprep.subr.bf16.mxu1 %v1312_v62  ;;  %v573_v62 = vld [vmem:[#allocation4 + $0x58] sm:$0xff]  ;;  %v1460_v5 = vpack.c.bf16 %v569_v59, %v565_v58  ;;  %v604_v58 = vld [vmem:[#allocation4 + $0x150] sm:$0xff] }
  0x76   :  { %1219 = vmatpush1.bf16.msra.mxu0 %v1218_v36  ;;  %v239_v36 = vld [vmem:[#allocation2 + $0x5d8] sm:$0xff]  ;;  %v1464_v9 = vpack.c.bf16 %v577_v0, %v573_v62  ;;  %v608_v59 = vld [vmem:[#allocation4 + $0x170] sm:$0xff]  ;;  %v626_v0 = vld [vmem:[#allocation4 + $0x200] sm:$0xff] }
  0x77   :  { %1221 = vmatprep.subr.bf16.mxu0 %v1220_v41  ;;  %v1326_v41 = vpack.c.bf16 %v234_v32, %v230_v28  ;;  %v1328_v46 = vpack.c.bf16 %v243_v37, %v239_v36  ;;  %v602_v28 = vld [vmem:[#allocation4 + $0x140] sm:$0xff]  ;;  %v1470_v32 = vpack.c.bf16 %v584_v23, %v580_v22  ;;  %v597_v36 = vld [vmem:[#allocation4 + $0x118] sm:$0xff] }
  0x78   :  { %1315 = vmatpush1.bf16.msra.mxu1 %v1314_v7  ;;  %v599_v7 = vld [vmem:[#allocation4 + $0x128] sm:$0xff]  ;;  %v1354_v37 = vpack.c.bf16 %v606_v29, %v602_v28  ;;  %v617_v62 = vld [vmem:[#allocation4 + $0x1b8] sm:$0xff] }
  0x79   :  { %1317 = vmatprep.subr.bf16.mxu1 %v1316_v10  ;;  %v572_v10 = vld [vmem:[#allocation4 + $0x50] sm:$0xff]  ;;  %v1348_v15 = vpack.c.bf16 %v599_v7, %v595_v6  ;;  %v633_v22 = vld [vmem:[#allocation4 + $0x238] sm:$0xff] }
  0x7a   :  { %1223 = vmatpush1.bf16.msra.mxu0 %v1222_v48  ;;  %v579_v48 = vld [vmem:[#allocation4 + $0x88] sm:$0xff]  ;;  %v1466_v20 = vpack.c.bf16 %v576_v11, %v572_v10  ;;  %v612_v6 = vld [vmem:[#allocation4 + $0x190] sm:$0xff]  ;;  %v625_v10 = vld [vmem:[#allocation4 + $0x1f8] sm:$0xff] }
  0x7b   :  { %1225 = vmatprep.subr.bf16.mxu0 %v1224_v53  ;;  %v1340_v52 = vpack.c.bf16 %v583_v49, %v579_v48  ;;  %v578_v53 = vld [vmem:[#allocation4 + $0x80] sm:$0xff]  ;;  %v605_v48 = vld [vmem:[#allocation4 + $0x158] sm:$0xff]  ;;  %v616_v7 = vld [vmem:[#allocation4 + $0x1b0] sm:$0xff] }
  0x7c   :  { %1319 = vmatpush1.bf16.msra.mxu1 %v1318_v17  ;;  %v1342_v63 = vpack.c.bf16 %v582_v54, %v578_v53  ;;  %v598_v17 = vld [vmem:[#allocation4 + $0x120] sm:$0xff]  ;;  %v627_v54 = vld [vmem:[#allocation4 + $0x208] sm:$0xff] }
  0x7d   :  { %1321 = vmatprep.subr.bf16.mxu1 %v1320_v19  ;;  %v607_v19 = vld [vmem:[#allocation4 + $0x168] sm:$0xff]  ;;  %v1350_v25 = vpack.c.bf16 %v598_v17, %v594_v16  ;;  %v622_v53 = vld [vmem:[#allocation4 + $0x1e0] sm:$0xff]  ;;  %v1486_v16 = vpack.c.bf16 %v616_v7, %v612_v6  ;;  %v665_v6 = vld [vmem:[#allocation4 + $0x338] sm:$0xff] }
  0x7e   :  { %1227 = vmatpush1.bf16.msra.mxu0 %v1226_v60  ;;  %v564_v60 = vld [vmem:[#allocation4 + $0x10] sm:$0xff] }
  0x7f   :  { %1229 = vmatprep.subr.bf16.mxu0 %v1228_v1  ;;  %v1344_v1 = vpack.c.bf16 %v591_v56, %v587_v55  ;;  %v631_v55 = vld [vmem:[#allocation4 + $0x228] sm:$0xff] }
  0x80   :  { %1323 = vmatpush1.bf16.msra.mxu1 %v1322_v27 }
  0x81   :  { %1325 = vmatprep.subr.bf16.mxu1 %v1324_v31  ;;  %v615_v31 = vld [vmem:[#allocation4 + $0x1a8] sm:$0xff] }
  0x82   :  { %1231 = vmatpush1.bf16.msra.mxu0 %v1230_v8  ;;  %v1462_v8 = vpack.c.bf16 %v568_v61, %v564_v60  ;;  %v613_v60 = vld [vmem:[#allocation4 + $0x198] sm:$0xff] }
  0x83   :  { %1233 = vmatprep.subr.bf16.mxu0 %v1232_v13  ;;  %v1346_v13 = vpack.c.bf16 %v590_v3, %v586_v2  ;;  %v635_v2 = vld [vmem:[#allocation4 + $0x248] sm:$0xff] }
  0x84   :  { %1327 = vmatpush1.bf16.msra.mxu1 %v1326_v41  ;;  %v614_v41 = vld [vmem:[#allocation4 + $0x1a0] sm:$0xff]  ;;  %v639_v3 = vld [vmem:[#allocation4 + $0x268] sm:$0xff] }
  0x85   :  { %1329 = vmatprep.subr.bf16.mxu1 %v1328_v46  ;;  %v596_v46 = vld [vmem:[#allocation4 + $0x110] sm:$0xff]  ;;  %v1368_v11 = vpack.c.bf16 %v639_v3, %v635_v2 }
  0x86   :  { %1235 = vmatpush1.bf16.msra.mxu0 %v1234_v18  ;;  %v603_v18 = vld [vmem:[#allocation4 + $0x148] sm:$0xff]  ;;  %v1478_v56 = vpack.c.bf16 %v600_v47, %v596_v46  ;;  %v649_v46 = vld [vmem:[#allocation4 + $0x2b8] sm:$0xff]  ;;  %v652_v2 = vld [vmem:[#allocation4 + $0x2d0] sm:$0xff] }
  0x87   :  { %377 = vmatprep.subr.mxu0 %v245_v24  ;;  %v589_v24 = vld [vmem:[#allocation4 + $0xd8] sm:$0xff]  ;;  %v1352_v27 = vpack.c.bf16 %v607_v19, %v603_v18  ;;  %v620_v18 = vld [vmem:[#allocation4 + $0x1d0] sm:$0xff] }
  0x88   :  { %1331 = vmatpush1.bf16.msra.mxu1 %v1330_v51  ;;  %v1472_v33 = vpack.c.bf16 %v593_v26, %v589_v24  ;;  %v624_v19 = vld [vmem:[#allocation4 + $0x1f0] sm:$0xff]  ;;  %v642_v24 = vld [vmem:[#allocation4 + $0x280] sm:$0xff]  ;;  %v651_v26 = vld [vmem:[#allocation4 + $0x2c8] sm:$0xff] }
  0x89   :  { %519 = vmatprep.subr.mxu1 %v247_v57  ;;  %v1490_v28 = vpack.c.bf16 %v624_v19, %v620_v18  ;;  %v656_v3 = vld [vmem:[#allocation4 + $0x2f0] sm:$0xff] }
  0x8a   :  { %378 = vmatpush1.msra.mxu0 %v244_v35  ;;  %v592_v35 = vld [vmem:[#allocation4 + $0xf0] sm:$0xff] }
  0x8b   :  { %410 = vmatmul.mubr.f32.vlgmr.msra.gmra.mrb[0].mxu0 %v50_v39  ;;  %1333 = vmatprep.subr.bf16.mxu0 %v1332_v38  ;;  %v601_v38 = vld [vmem:[#allocation4 + $0x138] sm:$0xff]  ;;  %v1474_v44 = vpack.c.bf16 %v592_v35, %v588_v34  ;;  %v668_v19 = vld [vmem:[#allocation4 + $0x350] sm:$0xff] }
  0x8c   :  { %1335 = vmatpush1.bf16.msra.mxu0 %v1334_v40  ;;  %520 = vmatpush1.msra.mxu1 %v246_v4  ;;  %v610_v40 = vld [vmem:[#allocation4 + $0x180] sm:$0xff]  ;;  %v1476_v45 = vpack.c.bf16 %v601_v38, %v597_v36  ;;  %v1482_v4 = vpack.c.bf16 %v608_v59, %v604_v58  ;;  %v641_v34 = vld [vmem:[#allocation4 + $0x278] sm:$0xff]  ;;  %v659_v38 = vld [vmem:[#allocation4 + $0x308] sm:$0xff] }
  0x8d   :  { %1337 = vmatprep.subr.bf16.mxu0 %v1336_v43  ;;  %552 = vmatmul.mubr.f32.vlgmr.msra.gmra.mrb[0].mxu1 %v50_v39  ;;  %v1356_v39 = vpack.c.bf16 %v615_v31, %v611_v30  ;;  %v623_v43 = vld [vmem:[#allocation4 + $0x1e8] sm:$0xff]  ;;  %v1358_v49 = vpack.c.bf16 %v614_v41, %v610_v40  ;;  %v628_v30 = vld [vmem:[#allocation4 + $0x210] sm:$0xff]  ;;  %v650_v36 = vld [vmem:[#allocation4 + $0x2c0] sm:$0xff] }
  0x8e   :  { %1461 = vmatprep.subr.bf16.mxu1 %v1460_v5  ;;  %v1360_v51 = vpack.c.bf16 %v623_v43, %v619_v42  ;;  %v1484_v5 = vpack.c.bf16 %v617_v62, %v613_v60  ;;  %v632_v31 = vld [vmem:[#allocation4 + $0x230] sm:$0xff]  ;;  %v657_v58 = vld [vmem:[#allocation4 + $0x2f8] sm:$0xff]  ;;  %v666_v60 = vld [vmem:[#allocation4 + $0x340] sm:$0xff] }
  0x8f   :  { %1463 = vmatpush1.bf16.msra.mxu1 %v1462_v8  ;;  %v621_v8 = vld [vmem:[#allocation4 + $0x1d8] sm:$0xff]  ;;  %v1494_v40 = vpack.c.bf16 %v632_v31, %v628_v30  ;;  %v636_v42 = vld [vmem:[#allocation4 + $0x250] sm:$0xff]  ;;  %v675_v62 = vld [vmem:[#allocation4 + $0x388] sm:$0xff] }
  0x90   :  { %1339 = vmatpush1.bf16.msra.mxu0 %v1338_v50  ;;  %1465 = vmatprep.subr.bf16.mxu1 %v1464_v9  ;;  %v609_v50 = vld [vmem:[#allocation4 + $0x178] sm:$0xff]  ;;  %v1488_v17 = vpack.c.bf16 %v625_v10, %v621_v8  ;;  %v640_v43 = vld [vmem:[#allocation4 + $0x270] sm:$0xff]  ;;  %v674_v8 = vld [vmem:[#allocation4 + $0x380] sm:$0xff]  ;;  %v1506_v10 = vpack.c.bf16 %v656_v3, %v652_v2 }
  0x91   :  { %1341 = vmatprep.subr.bf16.mxu0 %v1340_v52  ;;  %v618_v52 = vld [vmem:[#allocation4 + $0x1c0] sm:$0xff]  ;;  %v1480_v57 = vpack.c.bf16 %v609_v50, %v605_v48  ;;  %v667_v50 = vld [vmem:[#allocation4 + $0x348] sm:$0xff]  ;;  %v685_v30 = vld [vmem:[#allocation4 + $0x3d8] sm:$0xff] }
  0x92   :  { %v1362_v61 = vpack.c.bf16 %v622_v53, %v618_v52  ;;  %v658_v48 = vld [vmem:[#allocation4 + $0x300] sm:$0xff]  ;;  %v1498_v52 = vpack.c.bf16 %v640_v43, %v636_v42  ;;  %v693_v42 = vld [vmem:[#allocation4 + $0x418] sm:$0xff] }
  0x93   :  { %1467 = vmatpush1.bf16.msra.mxu1 %v1466_v20  ;;  %v629_v20 = vld [vmem:[#allocation4 + $0x218] sm:$0xff] }
  0x94   :  { %1343 = vmatpush1.bf16.msra.mxu0 %v1342_v63  ;;  %1469 = vmatprep.subr.bf16.mxu1 %v1468_v21  ;;  %v1364_v63 = vpack.c.bf16 %v631_v55, %v627_v54  ;;  %v1492_v29 = vpack.c.bf16 %v633_v22, %v629_v20  ;;  %v644_v54 = vld [vmem:[#allocation4 + $0x290] sm:$0xff]  ;;  %v681_v22 = vld [vmem:[#allocation4 + $0x3b8] sm:$0xff] }
  0x95   :  { %1345 = vmatprep.subr.bf16.mxu0 %v1344_v1  ;;  %v630_v1 = vld [vmem:[#allocation4 + $0x220] sm:$0xff]  ;;  %v648_v55 = vld [vmem:[#allocation4 + $0x2b0] sm:$0xff] }
  0x96   :  { %v1366_v9 = vpack.c.bf16 %v630_v1, %v626_v0  ;;  %v1502_v0 = vpack.c.bf16 %v648_v55, %v644_v54  ;;  %v672_v20 = vld [vmem:[#allocation4 + $0x370] sm:$0xff]  ;;  %v690_v54 = vld [vmem:[#allocation4 + $0x400] sm:$0xff] }
  0x97   :  { %1471 = vmatpush1.bf16.msra.mxu1 %v1470_v32  ;;  %v637_v32 = vld [vmem:[#allocation4 + $0x258] sm:$0xff]  ;;  %v694_v55 = vld [vmem:[#allocation4 + $0x420] sm:$0xff] }
  0x98   :  { %1347 = vmatpush1.bf16.msra.mxu0 %v1346_v13  ;;  %1473 = vmatprep.subr.bf16.mxu1 %v1472_v33  ;;  %v638_v13 = vld [vmem:[#allocation4 + $0x260] sm:$0xff]  ;;  %v1496_v41 = vpack.c.bf16 %v641_v34, %v637_v32  ;;  %v689_v32 = vld [vmem:[#allocation4 + $0x3f8] sm:$0xff]  ;;  %v1398_v2 = vpack.c.bf16 %v694_v55, %v690_v54  ;;  %v724_v55 = vld [vmem:[#allocation4 + $0x510] sm:$0xff] }
  0x99   :  { %1349 = vmatprep.subr.bf16.mxu0 %v1348_v15  ;;  %v647_v15 = vld [vmem:[#allocation4 + $0x2a8] sm:$0xff]  ;;  %v1370_v21 = vpack.c.bf16 %v638_v13, %v634_v12  ;;  %v660_v12 = vld [vmem:[#allocation4 + $0x310] sm:$0xff]  ;;  %v686_v34 = vld [vmem:[#allocation4 + $0x3e0] sm:$0xff] }
  0x9a   :  { %v1372_v23 = vpack.c.bf16 %v647_v15, %v643_v14  ;;  %v664_v13 = vld [vmem:[#allocation4 + $0x330] sm:$0xff]  ;;  %v669_v15 = vld [vmem:[#allocation4 + $0x358] sm:$0xff] }
  0x9b   :  { %1475 = vmatpush1.bf16.msra.mxu1 %v1474_v44  ;;  %v645_v44 = vld [vmem:[#allocation4 + $0x298] sm:$0xff] }
  0x9c   :  { %1351 = vmatpush1.bf16.msra.mxu0 %v1350_v25  ;;  %1477 = vmatprep.subr.bf16.mxu1 %v1476_v45  ;;  %v646_v25 = vld [vmem:[#allocation4 + $0x2a0] sm:$0xff]  ;;  %v1500_v53 = vpack.c.bf16 %v649_v46, %v645_v44  ;;  %v697_v44 = vld [vmem:[#allocation4 + $0x438] sm:$0xff]  ;;  %v250_v46 = vlaneseq }
  0x9d   :  { %1353 = vmatprep.subr.bf16.mxu0 %v1352_v27  ;;  %v655_v27 = vld [vmem:[#allocation4 + $0x2e8] sm:$0xff]  ;;  %v1374_v33 = vpack.c.bf16 %v646_v25, %v642_v24  ;;  %v676_v25 = vld [vmem:[#allocation4 + $0x390] sm:$0xff] }
  0x9e   :  { %v1376_v35 = vpack.c.bf16 %v655_v27, %v651_v26  ;;  %v680_v26 = vld [vmem:[#allocation4 + $0x3b0] sm:$0xff] }
  0x9f   :  { %1479 = vmatpush1.bf16.msra.mxu1 %v1478_v56  ;;  %v653_v56 = vld [vmem:[#allocation4 + $0x2d8] sm:$0xff]  ;;  %v1518_v27 = vpack.c.bf16 %v680_v26, %v676_v25  ;;  %v719_v26 = vld [vmem:[#allocation4 + $0x4e8] sm:$0xff] }
  0xa0   :  { %1355 = vmatpush1.bf16.msra.mxu0 %v1354_v37  ;;  %1481 = vmatprep.subr.bf16.mxu1 %v1480_v57  ;;  %v654_v37 = vld [vmem:[#allocation4 + $0x2e0] sm:$0xff]  ;;  %v1504_v1 = vpack.c.bf16 %v657_v58, %v653_v56  ;;  %v692_v58 = vld [vmem:[#allocation4 + $0x410] sm:$0xff] }
  0xa1   :  { %1357 = vmatprep.subr.bf16.mxu0 %v1356_v39  ;;  %v663_v39 = vld [vmem:[#allocation4 + $0x328] sm:$0xff]  ;;  %v1378_v45 = vpack.c.bf16 %v654_v37, %v650_v36  ;;  %v684_v37 = vld [vmem:[#allocation4 + $0x3d0] sm:$0xff] }
  0xa2   :  { %v1380_v47 = vpack.c.bf16 %v663_v39, %v659_v38  ;;  %v688_v38 = vld [vmem:[#allocation4 + $0x3f0] sm:$0xff] }
  0xa3   :  { %1483 = vmatpush1.bf16.msra.mxu1 %v1482_v4  ;;  %v661_v4 = vld [vmem:[#allocation4 + $0x318] sm:$0xff]  ;;  %v1522_v39 = vpack.c.bf16 %v688_v38, %v684_v37  ;;  %v716_v37 = vld [vmem:[#allocation4 + $0x4d0] sm:$0xff] }
  0xa4   :  { %1359 = vmatpush1.bf16.msra.mxu0 %v1358_v49  ;;  %1485 = vmatprep.subr.bf16.mxu1 %v1484_v5  ;;  %v662_v49 = vld [vmem:[#allocation4 + $0x320] sm:$0xff]  ;;  %v720_v38 = vld [vmem:[#allocation4 + $0x4f0] sm:$0xff] }
  0xa5   :  { %1361 = vmatprep.subr.bf16.mxu0 %v1360_v51  ;;  %v671_v51 = vld [vmem:[#allocation4 + $0x368] sm:$0xff]  ;;  %v1382_v57 = vpack.c.bf16 %v662_v49, %v658_v48  ;;  %v1738_v49 = vld [vmem:[%s1779_s2] sm:$0xf] }
  0xa6   :  { %v1384_v59 = vpack.c.bf16 %v671_v51, %v667_v50 }
  0xa7   :  { %1487 = vmatpush1.bf16.msra.mxu1 %v1486_v16  ;;  %v673_v16 = vld [vmem:[#allocation4 + $0x378] sm:$0xff] }
  0xa8   :  { %1363 = vmatpush1.bf16.msra.mxu0 %v1362_v61  ;;  %1489 = vmatprep.subr.bf16.mxu1 %v1488_v17  ;;  %v670_v61 = vld [vmem:[#allocation4 + $0x360] sm:$0xff]  ;;  %v1510_v17 = vpack.c.bf16 %v664_v13, %v660_v12  ;;  %v1512_v18 = vpack.c.bf16 %v673_v16, %v669_v15  ;;  %v711_v13 = vld [vmem:[#allocation4 + $0x4a8] sm:$0xff]  ;;  %v713_v15 = vld [vmem:[#allocation4 + $0x4b8] sm:$0xff] }
  0xa9   :  { %1365 = vmatprep.subr.bf16.mxu0 %v1364_v63  ;;  %v679_v63 = vld [vmem:[#allocation4 + $0x3a8] sm:$0xff]  ;;  %v1386_v5 = vpack.c.bf16 %v670_v61, %v666_v60 }
  0xaa   :  { %v1388_v7 = vpack.c.bf16 %v679_v63, %v675_v62  ;;  %v699_v60 = vld [vmem:[#allocation4 + $0x448] sm:$0xff]  ;;  %v701_v63 = vld [vmem:[#allocation4 + $0x458] sm:$0xff] }
  0xab   :  { %1491 = vmatpush1.bf16.msra.mxu1 %v1490_v28  ;;  %v683_v28 = vld [vmem:[#allocation4 + $0x3c8] sm:$0xff] }
  0xac   :  { %1367 = vmatpush1.bf16.msra.mxu0 %v1366_v9  ;;  %1493 = vmatprep.subr.bf16.mxu1 %v1492_v29  ;;  %v678_v9 = vld [vmem:[#allocation4 + $0x3a0] sm:$0xff]  ;;  %v687_v29 = vld [vmem:[#allocation4 + $0x3e8] sm:$0xff] }
  0xad   :  { %1369 = vmatprep.subr.bf16.mxu0 %v1368_v11  ;;  %v1508_v11 = vpack.c.bf16 %v665_v6, %v661_v4  ;;  %v1390_v14 = vpack.c.bf16 %v678_v9, %v674_v8  ;;  %v1392_v31 = vpack.c.bf16 %v687_v29, %v683_v28  ;;  %v703_v62 = vld [vmem:[#allocation4 + $0x468] sm:$0xff]  ;;  %v698_v4 = vld [vmem:[#allocation4 + $0x440] sm:$0xff]  ;;  %v700_v9 = vld [vmem:[#allocation4 + $0x450] sm:$0xff] }
  0xae   :  { %v721_v28 = vld [vmem:[#allocation4 + $0x4f8] sm:$0xff] }
  0xaf   :  { %1495 = vmatpush1.bf16.msra.mxu1 %v1494_v40  ;;  %v691_v40 = vld [vmem:[#allocation4 + $0x408] sm:$0xff] }
  0xb0   :  { %1371 = vmatpush1.bf16.msra.mxu0 %v1370_v21  ;;  %1497 = vmatprep.subr.bf16.mxu1 %v1496_v41  ;;  %v677_v21 = vld [vmem:[#allocation4 + $0x398] sm:$0xff]  ;;  %v695_v41 = vld [vmem:[#allocation4 + $0x428] sm:$0xff] }
  0xb1   :  { %1373 = vmatprep.subr.bf16.mxu0 %v1372_v23  ;;  %v1514_v23 = vpack.c.bf16 %v672_v20, %v668_v19  ;;  %v1516_v24 = vpack.c.bf16 %v681_v22, %v677_v21  ;;  %v1396_v43 = vpack.c.bf16 %v695_v41, %v691_v40  ;;  %v710_v19 = vld [vmem:[#allocation4 + $0x4a0] sm:$0xff]  ;;  %v708_v22 = vld [vmem:[#allocation4 + $0x490] sm:$0xff]  ;;  %v727_v41 = vld [vmem:[#allocation4 + $0x528] sm:$0xff] }
  0xb3   :  { %1499 = vmatpush1.bf16.msra.mxu1 %v1498_v52 }
  0xb4   :  { %1375 = vmatpush1.bf16.msra.mxu0 %v1374_v33  ;;  %1501 = vmatprep.subr.bf16.mxu1 %v1500_v53  ;;  %v682_v33 = vld [vmem:[#allocation4 + $0x3c0] sm:$0xff] }
  0xb5   :  { %1377 = vmatprep.subr.bf16.mxu0 %v1376_v35  ;;  %v1520_v35 = vpack.c.bf16 %v689_v32, %v685_v30  ;;  %v1394_v36 = vpack.c.bf16 %v686_v34, %v682_v33  ;;  %v714_v32 = vld [vmem:[#allocation4 + $0x4c0] sm:$0xff] }
  0xb6   :  { %v718_v33 = vld [vmem:[#allocation4 + $0x4e0] sm:$0xff] }
  0xb7   :  { %1503 = vmatpush1.bf16.msra.mxu1 %v1502_v0  ;;  %v705_v0 = vld [vmem:[#allocation4 + $0x478] sm:$0xff] }
  0xb8   :  { %1379 = vmatpush1.bf16.msra.mxu0 %v1378_v45  ;;  %1505 = vmatprep.subr.bf16.mxu1 %v1504_v1  ;;  %v1524_v45 = vpack.c.bf16 %v697_v44, %v693_v42  ;;  %v1528_v8 = vpack.c.bf16 %v705_v0, %v701_v63  ;;  %v725_v42 = vld [vmem:[#allocation4 + $0x518] sm:$0xff]  ;;  %v730_v63 = vld [vmem:[#allocation4 + $0x540] sm:$0xff] }
  0xb9   :  { %1381 = vmatprep.subr.bf16.mxu0 %v1380_v47  ;;  %v1732_v47 = vshrl.u32 %v250_v46, 7  ;;  %v1538_v46 = vpack.c.bf16 %v720_v38, %v716_v37  ;;  %v734_v0 = vld [vmem:[#allocation4 + $0x560] sm:$0xff] }
  0xba   :  { %v754_v37 = vld [vmem:[#allocation4 + $0x600] sm:$0xff] }
  0xbb   :  { %1507 = vmatpush1.bf16.msra.mxu1 %v1506_v10  ;;  %v252_v48 = vsub.s32 0, %v1732_v47  ;;  %v256_v50 = vsub.s32 1, %v1732_v47  ;;  %v704_v10 = vld [vmem:[#allocation4 + $0x470] sm:$0xff]  ;;  %v264_v12 = vsub.s32 3, %v1732_v47  ;;  %v758_v38 = vld [vmem:[#allocation4 + $0x620] sm:$0xff] }
  0xbc   :  { %1383 = vmatpush1.bf16.msra.mxu0 %v1382_v57  ;;  %1509 = vmatprep.subr.bf16.mxu1 %v1508_v11  ;;  %v707_v11 = vld [vmem:[#allocation4 + $0x488] sm:$0xff] }
  0xbd   :  { %1385 = vmatprep.subr.bf16.mxu0 %v1384_v59  ;;  %v253_v51 = vrot.slane %v1738_v49, %v252_v48  ;;  %v257_v52 = vrot.slane %v1738_v49, %v256_v50  ;;  %v696_v59 = vld [vmem:[#allocation4 + $0x430] sm:$0xff]  ;;  %v1404_v20 = vpack.c.bf16 %v711_v13, %v707_v11  ;;  %v265_v25 = vrot.slane %v1738_v49, %v264_v12  ;;  %v738_v11 = vld [vmem:[#allocation4 + $0x580] sm:$0xff] }
  0xbe   :  { %v1526_v3 = vpack.c.bf16 %v696_v59, %v692_v58  ;;  %v735_v58 = vld [vmem:[#allocation4 + $0x568] sm:$0xff]  ;;  %v733_v59 = vld [vmem:[#allocation4 + $0x558] sm:$0xff]  ;;  %v742_v13 = vld [vmem:[#allocation4 + $0x5a0] sm:$0xff] }
  0xbf   :  { %1511 = vmatpush1.bf16.msra.mxu1 %v1510_v17  ;;  %v1530_v17 = vpack.c.bf16 %v704_v10, %v700_v9  ;;  %v1418_v9 = vpack.c.bf16 %v734_v0, %v730_v63 }
  0xc0   :  { %1387 = vmatpush1.bf16.msra.mxu0 %v1386_v5  ;;  %1513 = vmatprep.subr.bf16.mxu1 %v1512_v18  ;;  %v702_v5 = vld [vmem:[#allocation4 + $0x460] sm:$0xff] }
  0xc1   :  { %1389 = vmatprep.subr.bf16.mxu0 %v1388_v7  ;;  %v1400_v7 = vpack.c.bf16 %v703_v62, %v699_v60  ;;  %v1402_v16 = vpack.c.bf16 %v702_v5, %v698_v4  ;;  %v706_v18 = vld [vmem:[#allocation4 + $0x480] sm:$0xff]  ;;  %v737_v60 = vld [vmem:[#allocation4 + $0x578] sm:$0xff]  ;;  %v736_v4 = vld [vmem:[#allocation4 + $0x570] sm:$0xff] }
  0xc2   :  { %v1406_v30 = vpack.c.bf16 %v710_v19, %v706_v18  ;;  %v739_v5 = vld [vmem:[#allocation4 + $0x588] sm:$0xff] }
  0xc3   :  { %1515 = vmatpush1.bf16.msra.mxu1 %v1514_v23  ;;  %v712_v23 = vld [vmem:[#allocation4 + $0x4b0] sm:$0xff]  ;;  %v747_v18 = vld [vmem:[#allocation4 + $0x5c8] sm:$0xff] }
  0xc4   :  { %1391 = vmatpush1.bf16.msra.mxu0 %v1390_v14  ;;  %1517 = vmatprep.subr.bf16.mxu1 %v1516_v24  ;;  %v709_v14 = vld [vmem:[#allocation4 + $0x498] sm:$0xff]  ;;  %v715_v24 = vld [vmem:[#allocation4 + $0x4c8] sm:$0xff] }
  0xc5   :  { %1393 = vmatprep.subr.bf16.mxu0 %v1392_v31  ;;  %v1532_v21 = vpack.c.bf16 %v713_v15, %v709_v14  ;;  %v1534_v31 = vpack.c.bf16 %v712_v23, %v708_v22  ;;  %v751_v19 = vld [vmem:[#allocation4 + $0x5e8] sm:$0xff]  ;;  %v1422_v22 = vpack.c.bf16 %v742_v13, %v738_v11 }
  0xc7   :  { %1519 = vmatpush1.bf16.msra.mxu1 %v1518_v27  ;;  %v717_v27 = vld [vmem:[#allocation4 + $0x4d8] sm:$0xff] }
  0xc8   :  { %1521 = vmatprep.subr.bf16.mxu1 %v1520_v35  ;;  %1395 = vmatpush1.bf16.msra.mxu0 %v1394_v36  ;;  %v1408_v35 = vpack.c.bf16 %v719_v26, %v715_v24  ;;  %v1536_v36 = vpack.c.bf16 %v721_v28, %v717_v27  ;;  %v746_v24 = vld [vmem:[#allocation4 + $0x5c0] sm:$0xff]  ;;  %v1424_v26 = vpack.c.bf16 %v751_v19, %v747_v18  ;;  %v748_v28 = vld [vmem:[#allocation4 + $0x5d0] sm:$0xff] }
  0xc9   :  { %1397 = vmatprep.subr.bf16.mxu0 %v1396_v43  ;;  %v729_v43 = vld [vmem:[#allocation4 + $0x538] sm:$0xff]  ;;  %v780_v18 = vld [vmem:[#allocation4 + $0x6d0] sm:$0xff] }
  0xca   :  { %v1540_v54 = vpack.c.bf16 %v729_v43, %v725_v42  ;;  %v760_v42 = vld [vmem:[#allocation4 + $0x630] sm:$0xff]  ;;  %v763_v43 = vld [vmem:[#allocation4 + $0x648] sm:$0xff] }
  0xcb   :  { %1523 = vmatpush1.bf16.msra.mxu1 %v1522_v39  ;;  %v723_v39 = vld [vmem:[#allocation4 + $0x508] sm:$0xff]  ;;  %v784_v19 = vld [vmem:[#allocation4 + $0x6f0] sm:$0xff] }
  0xcc   :  { %1525 = vmatprep.subr.bf16.mxu1 %v1524_v45  ;;  %v1410_v45 = vpack.c.bf16 %v718_v33, %v714_v32  ;;  %v759_v32 = vld [vmem:[#allocation4 + $0x628] sm:$0xff]  ;;  %v757_v33 = vld [vmem:[#allocation4 + $0x618] sm:$0xff] }
 0x15e   :  { %v411_v53 = vpop.f32.mrb[0].mxu0 }
 0x15f   :  { %v1588_v56 = vadd.f32 %v411_v53, %v253_v51  ;;  %v413_v57 = vpop.f32.mrb[1].mxu0  ;;  %v722_v51 = vld [vmem:[#allocation4 + $0x500] sm:$0xff]  ;;  %v1412_v53 = vpack.c.bf16 %v727_v41, %v723_v39  ;;  %v756_v41 = vld [vmem:[#allocation4 + $0x610] sm:$0xff] }
 0x160   :  { %v1589_v61 = vadd.f32 %v413_v57, %v257_v52  ;;  %v1751_v29 = vpop.f32.mrb[0].mxu1  ;;  %v726_v52 = vld [vmem:[#allocation4 + $0x520] sm:$0xff]  ;;  %v731_v57 = vld [vmem:[#allocation4 + $0x548] sm:$0xff] }
 0x161   :  { %v558_v6 = vmax.f32 %v1588_v56, 0.0  ;;  %v555_v34 = vpop.f32.mrb[1].mxu1  ;;  %v728_v56 = vld [vmem:[#allocation4 + $0x530] sm:$0xff] }
 0x162   :  { %v559_v1 = vmax.f32 %v1589_v61, 0.0  ;;  %v1591_v40 = vadd.f32 %v555_v34, %v265_v25  ;;  %v1414_v61 = vpack.c.bf16 %v726_v52, %v722_v51  ;;  %v1542_v62 = vpack.c.bf16 %v728_v56, %v724_v55  ;;  %v750_v25 = vld [vmem:[#allocation4 + $0x5e0] sm:$0xff]  ;;  %v761_v34 = vld [vmem:[#allocation4 + $0x638] sm:$0xff] }
 0x163   :  { %v1430_v51 = vpack.c.bf16 %v758_v38, %v754_v37  ;;  %v1558_v52 = vpack.c.bf16 %v760_v42, %v756_v41 }
 0x164   :  { %904 = vmatprep.mubr.f32.mxu0 %v559_v1  ;;  %1046 = vmatprep.mubr.f32.mxu1 %v559_v1  ;;  %v561_v44 = vmax.f32 %v1591_v40, 0.0  ;;  %v1416_v1 = vpack.c.bf16 %v735_v58, %v731_v57  ;;  %v1556_v40 = vpack.c.bf16 %v761_v34, %v757_v33  ;;  %v764_v57 = vld [vmem:[#allocation4 + $0x650] sm:$0xff]  ;;  %v795_v33 = vld [vmem:[#allocation4 + $0x748] sm:$0xff] }
 0x165   :  { %905 = vmatmul.mubr.f32.vlgmr.msra.gmra.mrb[2].mxu0 %v558_v6  ;;  %1047 = vmatmul.mubr.f32.vlgmr.msra.gmra.mrb[2].mxu1 %v558_v6  ;;  %v743_v6 = vld [vmem:[#allocation4 + $0x5a8] sm:$0xff]  ;;  %v768_v58 = vld [vmem:[#allocation4 + $0x670] sm:$0xff] }
 0x166   :  { %1399 = vmatpush1.bf16.msra.mxu0 %v1398_v2  ;;  %1527 = vmatpush1.bf16.msra.mxu1 %v1526_v3  ;;  %v1544_v2 = vpack.c.bf16 %v737_v60, %v733_v59  ;;  %v732_v3 = vld [vmem:[#allocation4 + $0x550] sm:$0xff]  ;;  %v1420_v14 = vpack.c.bf16 %v743_v6, %v739_v5  ;;  %v771_v59 = vld [vmem:[#allocation4 + $0x688] sm:$0xff]  ;;  %v1562_v0 = vpack.c.bf16 %v768_v58, %v764_v57  ;;  %v260_v57 = vsub.s32 2, %v1732_v47 }
 0x167   :  { %1401 = vmatprep.subr.bf16.mxu0 %v1400_v7  ;;  %1529 = vmatprep.subr.bf16.mxu1 %v1528_v8  ;;  %v741_v7 = vld [vmem:[#allocation4 + $0x598] sm:$0xff]  ;;  %v1546_v10 = vpack.c.bf16 %v736_v4, %v732_v3  ;;  %v775_v60 = vld [vmem:[#allocation4 + $0x6a8] sm:$0xff]  ;;  %v772_v5 = vld [vmem:[#allocation4 + $0x690] sm:$0xff] }
 0x168   :  { %975 = vmatprep.mubr.f32.mxu0 %v561_v44  ;;  %1117 = vmatprep.mubr.f32.mxu1 %v561_v44  ;;  %v745_v8 = vld [vmem:[#allocation4 + $0x5b8] sm:$0xff]  ;;  %v767_v44 = vld [vmem:[#allocation4 + $0x668] sm:$0xff]  ;;  %v1436_v3 = vpack.c.bf16 %v775_v60, %v771_v59  ;;  %v776_v6 = vld [vmem:[#allocation4 + $0x6b0] sm:$0xff] }
 0x169   :  { %v1548_v15 = vpack.c.bf16 %v745_v8, %v741_v7  ;;  %v1432_v55 = vpack.c.bf16 %v767_v44, %v763_v43  ;;  %v779_v7 = vld [vmem:[#allocation4 + $0x6c8] sm:$0xff]  ;;  %v1566_v13 = vpack.c.bf16 %v776_v6, %v772_v5  ;;  %v796_v43 = vld [vmem:[#allocation4 + $0x750] sm:$0xff]  ;;  %v261_v5 = vrot.slane %v1738_v49, %v260_v57  ;;  %v818_v49 = vld [vmem:[%s1781_s4] sm:$0xf] }
 0x16a   :  { %1403 = vmatpush1.bf16.msra.mxu0 %v1402_v16  ;;  %1531 = vmatpush1.bf16.msra.mxu1 %v1530_v17  ;;  %v740_v16 = vld [vmem:[#allocation4 + $0x590] sm:$0xff]  ;;  %v783_v8 = vld [vmem:[#allocation4 + $0x6e8] sm:$0xff] }
 0x16b   :  { %1405 = vmatprep.subr.bf16.mxu0 %v1404_v20  ;;  %1533 = vmatprep.subr.bf16.mxu1 %v1532_v21  ;;  %v744_v17 = vld [vmem:[#allocation4 + $0x5b0] sm:$0xff]  ;;  %v749_v20 = vld [vmem:[#allocation4 + $0x5d8] sm:$0xff]  ;;  %v799_v34 = vld [vmem:[#allocation4 + $0x768] sm:$0xff] }
 0x16c   :  { %v753_v21 = vld [vmem:[#allocation4 + $0x5f8] sm:$0xff]  ;;  %v1550_v23 = vpack.c.bf16 %v744_v17, %v740_v16  ;;  %v1440_v16 = vpack.c.bf16 %v783_v8, %v779_v7  ;;  %v1448_v41 = vpack.c.bf16 %v799_v34, %v795_v33  ;;  %v800_v44 = vld [vmem:[#allocation4 + $0x770] sm:$0xff]  ;;  %v814_v8 = vld [vmem:[#allocation4 + $0x7e0] sm:$0xff] }
 0x16d   :  { %v1552_v27 = vpack.c.bf16 %v753_v21, %v749_v20  ;;  %v787_v20 = vld [vmem:[#allocation4 + $0x708] sm:$0xff]  ;;  %v804_v60 = vld [vmem:[#allocation4 + $0x790] sm:$0xff] }
 0x16e   :  { %1407 = vmatpush1.bf16.msra.mxu0 %v1406_v30  ;;  %1535 = vmatpush1.bf16.msra.mxu1 %v1534_v31  ;;  %v752_v30 = vld [vmem:[#allocation4 + $0x5f0] sm:$0xff]  ;;  %v755_v31 = vld [vmem:[#allocation4 + $0x608] sm:$0xff] }
 0x16f   :  { %1409 = vmatprep.subr.bf16.mxu0 %v1408_v35  ;;  %1537 = vmatprep.subr.bf16.mxu1 %v1536_v36  ;;  %v1426_v35 = vpack.c.bf16 %v750_v25, %v746_v24  ;;  %v1554_v36 = vpack.c.bf16 %v752_v30, %v748_v28  ;;  %v1428_v39 = vpack.c.bf16 %v759_v32, %v755_v31  ;;  %v791_v21 = vld [vmem:[#allocation4 + $0x728] sm:$0xff]  ;;  %v788_v31 = vld [vmem:[#allocation4 + $0x710] sm:$0xff] }
 0x170   :  { %v1570_v25 = vpack.c.bf16 %v784_v19, %v780_v18  ;;  %v1444_v28 = vpack.c.bf16 %v791_v21, %v787_v20  ;;  %v792_v32 = vld [vmem:[#allocation4 + $0x730] sm:$0xff]  ;;  %v827_v18 = vrot.slane %v818_v49, %v256_v50 }
 0x171   :  { %v1574_v38 = vpack.c.bf16 %v792_v32, %v788_v31 }
 0x172   :  { %1411 = vmatpush1.bf16.msra.mxu0 %v1410_v45  ;;  %1539 = vmatpush1.bf16.msra.mxu1 %v1538_v46  ;;  %v765_v45 = vld [vmem:[#allocation4 + $0x658] sm:$0xff] }
 0x173   :  { %1413 = vmatprep.subr.bf16.mxu0 %v1412_v53  ;;  %1541 = vmatprep.subr.bf16.mxu1 %v1540_v54  ;;  %v769_v46 = vld [vmem:[#allocation4 + $0x678] sm:$0xff]  ;;  %v762_v53 = vld [vmem:[#allocation4 + $0x640] sm:$0xff] }
 0x174   :  { %v766_v54 = vld [vmem:[#allocation4 + $0x660] sm:$0xff]  ;;  %v1560_v56 = vpack.c.bf16 %v769_v46, %v765_v45  ;;  %v803_v45 = vld [vmem:[#allocation4 + $0x788] sm:$0xff] }
 0x175   :  { %v1434_v63 = vpack.c.bf16 %v766_v54, %v762_v53  ;;  %v807_v46 = vld [vmem:[#allocation4 + $0x7a8] sm:$0xff]  ;;  %v1578_v54 = vpack.c.bf16 %v800_v44, %v796_v43 }
 0x176   :  { %1415 = vmatpush1.bf16.msra.mxu0 %v1414_v61  ;;  %1543 = vmatpush1.bf16.msra.mxu1 %v1542_v62  ;;  %v773_v61 = vld [vmem:[#allocation4 + $0x698] sm:$0xff]  ;;  %v1452_v58 = vpack.c.bf16 %v807_v46, %v803_v45 }
 0x177   :  { %1417 = vmatprep.subr.bf16.mxu0 %v1416_v1  ;;  %1545 = vmatprep.subr.bf16.mxu1 %v1544_v2  ;;  %v777_v62 = vld [vmem:[#allocation4 + $0x6b8] sm:$0xff]  ;;  %v770_v1 = vld [vmem:[#allocation4 + $0x680] sm:$0xff] }
 0x178   :  { %v774_v2 = vld [vmem:[#allocation4 + $0x6a0] sm:$0xff]  ;;  %v1564_v4 = vpack.c.bf16 %v777_v62, %v773_v61  ;;  %v808_v61 = vld [vmem:[#allocation4 + $0x7b0] sm:$0xff]  ;;  %v811_v62 = vld [vmem:[#allocation4 + $0x7c8] sm:$0xff] }
 0x179   :  { %v1438_v11 = vpack.c.bf16 %v774_v2, %v770_v1  ;;  %v817_v1 = vld [vmem:[#allocation4 + $0x7f8] sm:$0xff] }
 0x17a   :  { %1419 = vmatpush1.bf16.msra.mxu0 %v1418_v9  ;;  %1547 = vmatpush1.bf16.msra.mxu1 %v1546_v10  ;;  %v781_v9 = vld [vmem:[#allocation4 + $0x6d8] sm:$0xff] }
 0x17b   :  { %1421 = vmatprep.subr.bf16.mxu0 %v1420_v14  ;;  %1549 = vmatprep.subr.bf16.mxu1 %v1548_v15  ;;  %v785_v10 = vld [vmem:[#allocation4 + $0x6f8] sm:$0xff]  ;;  %v778_v14 = vld [vmem:[#allocation4 + $0x6c0] sm:$0xff] }
 0x17c   :  { %v782_v15 = vld [vmem:[#allocation4 + $0x6e0] sm:$0xff]  ;;  %v1568_v17 = vpack.c.bf16 %v785_v10, %v781_v9  ;;  %v812_v9 = vld [vmem:[#allocation4 + $0x7d0] sm:$0xff] }
 0x17d   :  { %v1442_v24 = vpack.c.bf16 %v782_v15, %v778_v14  ;;  %v816_v10 = vld [vmem:[#allocation4 + $0x7f0] sm:$0xff]  ;;  %v1590_v14 = vadd.f32 %v1751_v29, %v261_v5  ;;  %v835_v29 = vrot.slane %v818_v49, %v264_v12 }
 0x17e   :  { %1423 = vmatpush1.bf16.msra.mxu0 %v1422_v22  ;;  %1551 = vmatpush1.bf16.msra.mxu1 %v1550_v23  ;;  %v789_v22 = vld [vmem:[#allocation4 + $0x718] sm:$0xff] }
 0x17f   :  { %1425 = vmatprep.subr.bf16.mxu0 %v1424_v26  ;;  %1553 = vmatprep.subr.bf16.mxu1 %v1552_v27  ;;  %v793_v23 = vld [vmem:[#allocation4 + $0x738] sm:$0xff]  ;;  %v786_v26 = vld [vmem:[#allocation4 + $0x700] sm:$0xff]  ;;  %v560_v15 = vmax.f32 %v1590_v14, 0.0 }
 0x180   :  { %v790_v27 = vld [vmem:[#allocation4 + $0x720] sm:$0xff]  ;;  %v1572_v30 = vpack.c.bf16 %v793_v23, %v789_v22 }
 0x181   :  { %v1446_v37 = vpack.c.bf16 %v790_v27, %v786_v26 }
 0x182   :  { %1427 = vmatpush1.bf16.msra.mxu0 %v1426_v35  ;;  %1555 = vmatpush1.bf16.msra.mxu1 %v1554_v36  ;;  %v797_v35 = vld [vmem:[#allocation4 + $0x758] sm:$0xff] }
 0x183   :  { %1429 = vmatprep.subr.bf16.mxu0 %v1428_v39  ;;  %1557 = vmatprep.subr.bf16.mxu1 %v1556_v40  ;;  %v801_v36 = vld [vmem:[#allocation4 + $0x778] sm:$0xff]  ;;  %v794_v39 = vld [vmem:[#allocation4 + $0x740] sm:$0xff] }
 0x184   :  { %v798_v40 = vld [vmem:[#allocation4 + $0x760] sm:$0xff]  ;;  %v1576_v42 = vpack.c.bf16 %v801_v36, %v797_v35 }
 0x185   :  { %v1450_v53 = vpack.c.bf16 %v798_v40, %v794_v39 }
 0x186   :  { %1431 = vmatpush1.bf16.msra.mxu0 %v1430_v51  ;;  %1559 = vmatpush1.bf16.msra.mxu1 %v1558_v52  ;;  %v805_v51 = vld [vmem:[#allocation4 + $0x798] sm:$0xff] }
 0x187   :  { %1433 = vmatprep.subr.bf16.mxu0 %v1432_v55  ;;  %1561 = vmatprep.subr.bf16.mxu1 %v1560_v56  ;;  %v809_v52 = vld [vmem:[#allocation4 + $0x7b8] sm:$0xff]  ;;  %v802_v55 = vld [vmem:[#allocation4 + $0x780] sm:$0xff] }
 0x188   :  { %v806_v56 = vld [vmem:[#allocation4 + $0x7a0] sm:$0xff]  ;;  %v1580_v59 = vpack.c.bf16 %v809_v52, %v805_v51 }
 0x189   :  { %v1454_v2 = vpack.c.bf16 %v806_v56, %v802_v55 }
 0x18a   :  { %1435 = vmatpush1.bf16.msra.mxu0 %v1434_v63  ;;  %1563 = vmatpush1.bf16.msra.mxu1 %v1562_v0  ;;  %v815_v63 = vld [vmem:[#allocation4 + $0x7e8] sm:$0xff]  ;;  %v813_v0 = vld [vmem:[#allocation4 + $0x7d8] sm:$0xff] }
 0x18b   :  { %1437 = vmatprep.subr.bf16.mxu0 %v1436_v3  ;;  %1565 = vmatprep.subr.bf16.mxu1 %v1564_v4  ;;  %v1582_v3 = vpack.c.bf16 %v808_v61, %v804_v60  ;;  %v810_v4 = vld [vmem:[#allocation4 + $0x7c0] sm:$0xff]  ;;  %v1456_v6 = vpack.c.bf16 %v815_v63, %v811_v62  ;;  %v1584_v7 = vpack.c.bf16 %v817_v1, %v813_v0 }
 0x18e   :  { %1439 = vmatpush1.bf16.msra.mxu0 %v1438_v11  ;;  %1567 = vmatpush1.bf16.msra.mxu1 %v1566_v13  ;;  %v1458_v11 = vpack.c.bf16 %v814_v8, %v810_v4  ;;  %v1586_v13 = vpack.c.bf16 %v816_v10, %v812_v9 }
 0x18f   :  { %1441 = vmatprep.subr.bf16.mxu0 %v1440_v16  ;;  %1569 = vmatprep.subr.bf16.mxu1 %v1568_v17  ;;  %v823_v16 = vrot.slane %v818_v49, %v252_v48  ;;  %v831_v17 = vrot.slane %v818_v49, %v260_v57 }
 0x192   :  { %1443 = vmatpush1.bf16.msra.mxu0 %v1442_v24  ;;  %1571 = vmatpush1.bf16.msra.mxu1 %v1570_v25 }
 0x193   :  { %1445 = vmatprep.subr.bf16.mxu0 %v1444_v28  ;;  %1573 = vmatprep.subr.bf16.mxu1 %v1572_v30 }
 0x196   :  { %1447 = vmatpush1.bf16.msra.mxu0 %v1446_v37  ;;  %1575 = vmatpush1.bf16.msra.mxu1 %v1574_v38 }
 0x197   :  { %1449 = vmatprep.subr.bf16.mxu0 %v1448_v41  ;;  %1577 = vmatprep.subr.bf16.mxu1 %v1576_v42 }
 0x19a   :  { %1451 = vmatpush1.bf16.msra.mxu0 %v1450_v53  ;;  %1579 = vmatpush1.bf16.msra.mxu1 %v1578_v54 }
 0x19b   :  { %1453 = vmatprep.subr.bf16.mxu0 %v1452_v58  ;;  %1581 = vmatprep.subr.bf16.mxu1 %v1580_v59 }
 0x19e   :  { %1455 = vmatpush1.bf16.msra.mxu0 %v1454_v2  ;;  %1583 = vmatpush1.bf16.msra.mxu1 %v1582_v3 }
 0x19f   :  { %1457 = vmatprep.subr.bf16.mxu0 %v1456_v6  ;;  %1585 = vmatprep.subr.bf16.mxu1 %v1584_v7 }
 0x1a2   :  { %1459 = vmatpush1.bf16.msra.mxu0 %v1458_v11  ;;  %1587 = vmatpush1.bf16.msra.mxu1 %v1586_v13 }
 0x1a5   :  { %976 = vmatmul.mubr.f32.vlgmr.msra.gmra.mrb[2].mxu0 %v560_v15  ;;  %1118 = vmatmul.mubr.f32.vlgmr.msra.gmra.mrb[2].mxu1 %v560_v15 }
 0x278   :  { %v977_v19 = vpop.f32.mrb[2].mxu0  ;;  %v1119_v20 = vpop.f32.mrb[2].mxu1 }
 0x279   :  { %v1592_v21 = vadd.f32 %v977_v19, %v823_v16  ;;  %v1594_v22 = vadd.f32 %v1119_v20, %v831_v17  ;;  %v979_v23 = vpop.f32.mrb[3].mxu0  ;;  %v1121_v24 = vpop.f32.mrb[3].mxu1 }
 0x27a   :  { %v1593_v25 = vadd.f32 %v979_v23, %v827_v18  ;;  %v1595_v26 = vadd.f32 %v1121_v24, %v835_v29 }
 0x27b   :  { %v1124_v27 = vmax.f32 %v1592_v21, 0.0  ;;  %v1126_v28 = vmax.f32 %v1594_v22, 0.0 }
 0x27c   :  { %v1125_v30 = vmax.f32 %v1593_v25, 0.0  ;;  %v1127_v31 = vmax.f32 %v1595_v26, 0.0 }
 0x27d   :  { %1128 = vst [vmem:[%s1782_s5] sm:$0xff] %v1124_v27  ;;  %1130 = vst [vmem:[%s1782_s5 + $0x10] sm:$0xff] %v1126_v28 }
 0x27e   :  { %1129 = vst [vmem:[%s1782_s5 + $0x8] sm:$0xff] %v1125_v30  ;;  %1131 = vst [vmem:[%s1782_s5 + $0x18] sm:$0xff] %v1127_v31 }
 0x27f   :  { %1136 = vsyncpa [#allocation3], 1 }
 0x280   :  { %1137 = vsyncpa [#allocation5], 1 }

</bundles_post_ra>
